<compile_context>
chip_gen: v6e
topology: v6e:2x2x1
jax: 0.10.0
libtpu: 0.0.40
codegen_flags: <defaults>
</compile_context>

<pallas_src>
import functools

import jax
import jax.numpy as jnp
from jax.experimental import pallas as pl
from jax.experimental.pallas import tpu as pltpu


def _attnpool_kernel(x_ref, pos0_ref, pos_sp_ref, wq_ref, bq_ref,
                     wkv_ref, bkv_ref, wc_ref, bc_ref, sel_ref, selT_ref,
                     o_ref, *, scale, block_b, hw, hw_pad):
    f32 = jnp.float32
    bf16 = jnp.bfloat16
    bt = block_b
    C = wq_ref.shape[0]

    xs = x_ref[...]                                   # (bt*hw_pad, C) bf16, pad rows = 0

    # ---- token build (no identity matmul) -----------------------------------
    # mean token: 8-aligned reshape + sum over the per-batch spatial rows.
    xs3 = xs.reshape(bt, hw_pad, C).astype(f32)       # (bt, hw_pad, C) f32
    mean_tok = jnp.sum(xs3, axis=1) * (1.0 / hw) + pos0_ref[...]       # (bt, C) f32
    mean_bf = mean_tok.astype(bf16)
    # spatial tokens: x + positional embedding (f32 add, bf16 only at the MXU).
    sp_bf = (xs3 + pos_sp_ref[...][None, :, :]).reshape(bt * hw_pad, C).astype(bf16)

    # ---- projections: bf16 on the MXU, f32 accumulation; fused K/V weights --
    q = (jnp.dot(mean_bf, wq_ref[...], preferred_element_type=f32)
         + bq_ref[...]) * scale                                        # (bt, C)
    kv_m = jnp.dot(mean_bf, wkv_ref[...], preferred_element_type=f32) + bkv_ref[...]
    kv_s = jnp.dot(sp_bf, wkv_ref[...], preferred_element_type=f32) + bkv_ref[...]
    k_m, v_m = kv_m[:, :C], kv_m[:, C:]                                # (bt, C)
    k_s, v_s = kv_s[:, :C], kv_s[:, C:]                                # (bt*hw_pad, C)

    # ---- per-head scores via the block-diagonal head selector (f32) ---------
    s0 = jnp.dot(q * k_m, sel_ref[...], preferred_element_type=f32)    # (bt, H)
    qk = (k_s.reshape(bt, hw_pad, C) * q[:, None, :]).reshape(bt * hw_pad, C)
    s_sp = jnp.dot(qk, sel_ref[...], preferred_element_type=f32)       # (bt*hw_pad, H)
    nh = s_sp.shape[-1]
    s_sp3 = s_sp.reshape(bt, hw_pad, nh)                               # (bt, hw_pad, H)
    if hw_pad != hw:   # mask padded spatial rows out of the softmax
        row = jax.lax.broadcasted_iota(jnp.int32, (1, hw_pad, 1), 1)
        s_sp3 = s_sp3 + jnp.where(row < hw, 0.0, -1e30)

    # ---- numerically-stable softmax over each batch's (hw+1) tokens ---------
    m = jnp.maximum(jnp.max(s_sp3, axis=1), s0)                        # (bt, H)
    p0 = jnp.exp(s0 - m)                                               # (bt, H)
    p_sp3 = jnp.exp(s_sp3 - m[:, None, :])                             # (bt, hw_pad, H)
    denom = p0 + jnp.sum(p_sp3, axis=1)                                # (bt, H)
    recip = pl.reciprocal(denom, approx=False)                         # exact

    # ---- attention-weighted values ------------------------------------------
    p_sp_ch = jnp.dot(p_sp3.reshape(bt * hw_pad, nh), selT_ref[...],
                      preferred_element_type=f32)                      # (bt*hw_pad, C)
    acc = jnp.sum((p_sp_ch * v_s).reshape(bt, hw_pad, C), axis=1)      # (bt, C)
    p0_ch = jnp.dot(p0, selT_ref[...], preferred_element_type=f32)     # (bt, C)
    ctx = (acc + p0_ch * v_m) * jnp.dot(recip, selT_ref[...],
                                        preferred_element_type=f32)    # (bt, C)

    out = (jnp.dot(ctx.astype(bf16), wc_ref[...], preferred_element_type=f32)
           + bc_ref[...])                                              # (bt, O_pad)
    o_ref[...] = out.astype(o_ref.dtype)


def attention_pool2d(x, params, num_heads, *, block_b=8):
    """x: (B, C, H, W) float32.  Returns (B, output_dim) float32."""
    B, C, H, W = x.shape
    hw = H * W
    O = params["wc"].shape[0]
    head_dim = C // num_heads
    scale = float(head_dim) ** -0.5

    bt = max(8, ((block_b + 7) // 8) * 8)            # sublane-dense output rows
    B_pad = ((B + bt - 1) // bt) * bt
    hw_pad = ((hw + 7) // 8) * 8                     # 8-aligned per-batch segment
    O_pad = ((O + 127) // 128) * 128                 # lane-dense output store

    # NCHW -> per-batch-contiguous token-major (B_pad, hw_pad, C), bf16.
    # TODO(synk): consume NCHW channel-major directly inside the kernel to drop
    #             this wrapper transpose's extra HBM round trip of x (v5e win).
    x_t = jnp.transpose(x.reshape(B, C, hw), (0, 2, 1))                # (B, hw, C)
    x_t = jnp.pad(x_t, ((0, B_pad - B), (0, hw_pad - hw), (0, 0)))
    x_t = x_t.reshape(B_pad * hw_pad, C).astype(jnp.bfloat16)

    # Positional embedding kept in f32 (avoid an extra bf16 rounding step).
    pos = params["pos"].astype(jnp.float32)
    pos0 = pos[:1, :]                                                  # (1, C)
    pos_sp = jnp.pad(pos[1:hw + 1, :], ((0, hw_pad - hw), (0, 0)))     # (hw_pad, C)

    # Weights: PyTorch (out,in) -> (in,out), bf16 for the MXU; K/V fused.
    wq = params["wq"].T.astype(jnp.bfloat16)
    wkv = jnp.concatenate([params["wk"].T, params["wv"].T],
                          axis=1).astype(jnp.bfloat16)                 # (C, 2C)
    wc = params["wc"].T.astype(jnp.bfloat16)
    bq = params["bq"].reshape(1, C).astype(jnp.float32)
    bkv = jnp.concatenate([params["bk"], params["bv"]]
                          ).reshape(1, 2 * C).astype(jnp.float32)
    bc = params["bc"].reshape(1, O).astype(jnp.float32)
    if O_pad != O:
        wc = jnp.pad(wc, ((0, 0), (0, O_pad - O)))
        bc = jnp.pad(bc, ((0, 0), (0, O_pad - O)))

    # Block-diagonal head selector (C, H) and its transpose (f32, exact 0/1).
    sel = ((jnp.arange(C)[:, None] // head_dim) ==
           jnp.arange(num_heads)[None, :]).astype(jnp.float32)
    selT = sel.T

    # VMEM budget: single-buffered constants + double-buffered x/out tiles +
    # live f32 intermediates; generation-aware clamp (v7x has 64 MiB per TC).
    const_bytes = ((3 * C * C + C * O_pad) * 2
                   + (hw_pad * C + 5 * C + O_pad + 2 * C * num_heads) * 4)
    io_bytes = 2 * (bt * hw_pad * C * 2) + 2 * (bt * O_pad * 4)
    work_bytes = 8 * bt * hw_pad * C * 4
    try:
        phys = int(getattr(pltpu.get_tpu_info(), "vmem_capacity_bytes",
                           64 * 1024 * 1024))
    except Exception:
        phys = 64 * 1024 * 1024
    ceiling = (96 * 1024 * 1024 if phys >= 128 * 1024 * 1024
               else int(phys * 0.8))
    vmem_limit = int(min(max(const_bytes + io_bytes + work_bytes,
                             32 * 1024 * 1024), ceiling))

    kernel = functools.partial(_attnpool_kernel, scale=scale, block_b=bt,
                               hw=hw, hw_pad=hw_pad)
    single = pl.Buffered(1)          # constant-index inputs: 1 buffer is enough
    const2d = lambda i: (0, 0)

    out = pl.pallas_call(
        kernel,
        out_shape=jax.ShapeDtypeStruct((B_pad, O_pad), jnp.float32),
        grid_spec=pltpu.PrefetchScalarGridSpec(
            num_scalar_prefetch=0,
            grid=(B_pad // bt,),
            in_specs=[
                pl.BlockSpec((bt * hw_pad, C), lambda i: (i, 0)),       # x tokens
                pl.BlockSpec((1, C), const2d, pipeline_mode=single),     # pos[0]
                pl.BlockSpec((hw_pad, C), const2d, pipeline_mode=single),  # pos[1:]
                pl.BlockSpec((C, C), const2d, pipeline_mode=single),     # wq
                pl.BlockSpec((1, C), const2d, pipeline_mode=single),     # bq
                pl.BlockSpec((C, 2 * C), const2d, pipeline_mode=single), # wk|wv
                pl.BlockSpec((1, 2 * C), const2d, pipeline_mode=single), # bk|bv
                pl.BlockSpec((C, O_pad), const2d, pipeline_mode=single), # wc
                pl.BlockSpec((1, O_pad), const2d, pipeline_mode=single), # bc
                pl.BlockSpec((C, num_heads), const2d, pipeline_mode=single),  # sel
                pl.BlockSpec((num_heads, C), const2d, pipeline_mode=single),  # sel^T
            ],
            out_specs=pl.BlockSpec((bt, O_pad), lambda i: (i, 0)),
        ),
        compiler_params=pltpu.CompilerParams(
            dimension_semantics=("parallel",),
            vmem_limit_bytes=vmem_limit),
    )(x_t, pos0, pos_sp, wq, bq, wkv, bkv, wc, bc, sel, selT)
    return out[:B, :O]


def attention_pool2d_reference(x, params, num_heads):
    """Pure-JAX (f32) mirror of the PyTorch forward pass, for verification."""
    B, C, H, W = x.shape
    hw = H * W
    xf = jnp.transpose(x.reshape(B, C, hw), (2, 0, 1))        # (HW, B, C)
    xc = jnp.concatenate([xf.mean(axis=0, keepdims=True), xf], axis=0)
    L = hw + 1
    xc = xc + params["pos"][:L][:, None, :]
    head_dim = C // num_heads
    scale = float(head_dim) ** -0.5
    q = (xc[:1] @ params["wq"].T + params["bq"]) * scale      # (1, B, C)
    k = xc @ params["wk"].T + params["bk"]                    # (L, B, C)
    v = xc @ params["wv"].T + params["bv"]
    qh = q.reshape(1, B, num_heads, head_dim)
    kh = k.reshape(L, B, num_heads, head_dim)
    vh = v.reshape(L, B, num_heads, head_dim)
    scores = jnp.einsum("qbhd,kbhd->bhqk", qh, kh)
    attn = jax.nn.softmax(scores, axis=-1)
    ctx = jnp.einsum("bhqk,kbhd->qbhd", attn, vh).reshape(1, B, C)
    out = ctx @ params["wc"].T + params["bc"]                 # (1, B, O)
    return out[0]                                             # (B, O)


if __name__ == "__main__":
    B = 2
    embed_dim = 32
    num_heads = 4
    Hs = Ws = 4
    spacial_dim = Hs * Ws
    output_dim = 64

    key = jax.random.PRNGKey(0)
    ks = jax.random.split(key, 10)
    params = {
        "pos": jax.random.normal(ks[0], (spacial_dim + 1, embed_dim),
                                 jnp.float32) / embed_dim ** 0.5,
        "wq": jax.random.normal(ks[1], (embed_dim, embed_dim), jnp.float32) * 0.05,
        "bq": jax.random.normal(ks[2], (embed_dim,), jnp.float32) * 0.05,
        "wk": jax.random.normal(ks[3], (embed_dim, embed_dim), jnp.float32) * 0.05,
        "bk": jax.random.normal(ks[4], (embed_dim,), jnp.float32) * 0.05,
        "wv": jax.random.normal(ks[5], (embed_dim, embed_dim), jnp.float32) * 0.05,
        "bv": jax.random.normal(ks[6], (embed_dim,), jnp.float32) * 0.05,
        "wc": jax.random.normal(ks[7], (output_dim, embed_dim), jnp.float32) * 0.05,
        "bc": jax.random.normal(ks[8], (output_dim,), jnp.float32) * 0.05,
    }
    x = jax.random.normal(ks[9], (B, embed_dim, Hs, Ws), jnp.float32)

    out = attention_pool2d(x, params, num_heads)
    out = jax.block_until_ready(out)

    ref = jax.block_until_ready(attention_pool2d_reference(x, params, num_heads))
    assert out.shape == (B, output_dim), out.shape
    # bf16 weights/activations on the MXU => slightly looser tolerance than f32
    err = float(jnp.max(jnp.abs(out - ref)))
    assert jnp.allclose(out, ref, atol=2e-2, rtol=2e-2), err

    print("KERNEL_OK")
</pallas_src>

<mosaic_0001>
module attributes {stable_mosaic.version = 11 : i64} {
  func.func @_attnpool_kernel(%arg0: i32, %arg1: memref<128x32xbf16, #tpu.memory_space<vmem>>, %arg2: memref<1x32xf32, #tpu.memory_space<vmem>>, %arg3: memref<16x32xf32, #tpu.memory_space<vmem>>, %arg4: memref<32x32xbf16, #tpu.memory_space<vmem>>, %arg5: memref<1x32xf32, #tpu.memory_space<vmem>>, %arg6: memref<32x64xbf16, #tpu.memory_space<vmem>>, %arg7: memref<1x64xf32, #tpu.memory_space<vmem>>, %arg8: memref<32x128xbf16, #tpu.memory_space<vmem>>, %arg9: memref<1x128xf32, #tpu.memory_space<vmem>>, %arg10: memref<32x4xf32, #tpu.memory_space<vmem>>, %arg11: memref<4x32xf32, #tpu.memory_space<vmem>>, %arg12: memref<8x128xf32, #tpu.memory_space<vmem>>) attributes {dimension_semantics = [#tpu.dimension_semantics<parallel>], iteration_bounds = array<i64: 1>, scalar_prefetch = 0 : i64, scratch_operands = 0 : i64, tpu.core_type = #tpu.core_type<tc>, window_params = [{transform_indices = @transform_0, window_bounds = array<i64: 128, 32>}, {pipeline_mode = #tpu.pipeline_mode<synchronous>, transform_indices = @transform_1, window_bounds = array<i64: 1, 32>}, {pipeline_mode = #tpu.pipeline_mode<synchronous>, transform_indices = @transform_2, window_bounds = array<i64: 16, 32>}, {pipeline_mode = #tpu.pipeline_mode<synchronous>, transform_indices = @transform_3, window_bounds = array<i64: 32, 32>}, {pipeline_mode = #tpu.pipeline_mode<synchronous>, transform_indices = @transform_4, window_bounds = array<i64: 1, 32>}, {pipeline_mode = #tpu.pipeline_mode<synchronous>, transform_indices = @transform_5, window_bounds = array<i64: 32, 64>}, {pipeline_mode = #tpu.pipeline_mode<synchronous>, transform_indices = @transform_6, window_bounds = array<i64: 1, 64>}, {pipeline_mode = #tpu.pipeline_mode<synchronous>, transform_indices = @transform_7, window_bounds = array<i64: 32, 128>}, {pipeline_mode = #tpu.pipeline_mode<synchronous>, transform_indices = @transform_8, window_bounds = array<i64: 1, 128>}, {pipeline_mode = #tpu.pipeline_mode<synchronous>, transform_indices = @transform_9, window_bounds = array<i64: 32, 4>}, {pipeline_mode = #tpu.pipeline_mode<synchronous>, transform_indices = @transform_10, window_bounds = array<i64: 4, 32>}, {transform_indices = @transform_11, window_bounds = array<i64: 8, 128>}]} {
    %c0 = arith.constant 0 : index
    %c0_0 = arith.constant 0 : index
    %0 = vector.load %arg1[%c0, %c0_0] : memref<128x32xbf16, #tpu.memory_space<vmem>>, vector<128x32xbf16>
    %1 = vector.shape_cast %0 : vector<128x32xbf16> to vector<8x16x32xbf16>
    %2 = arith.extf %1 : vector<8x16x32xbf16> to vector<8x16x32xf32>
    %cst = arith.constant dense<0.000000e+00> : vector<8x32xf32>
    %3 = vector.multi_reduction <add>, %2, %cst [1] : vector<8x16x32xf32> to vector<8x32xf32>
    %cst_1 = arith.constant 6.250000e-02 : f32
    %4 = vector.broadcast %cst_1 : f32 to vector<8x32xf32>
    %5 = arith.mulf %3, %4 : vector<8x32xf32>
    %c0_2 = arith.constant 0 : index
    %c0_3 = arith.constant 0 : index
    %6 = vector.load %arg2[%c0_2, %c0_3] : memref<1x32xf32, #tpu.memory_space<vmem>>, vector<1x32xf32>
    %7 = vector.broadcast %6 : vector<1x32xf32> to vector<8x32xf32>
    %8 = arith.addf %5, %7 : vector<8x32xf32>
    %9 = arith.truncf %8 : vector<8x32xf32> to vector<8x32xbf16>
    %c0_4 = arith.constant 0 : index
    %c0_5 = arith.constant 0 : index
    %10 = vector.load %arg3[%c0_4, %c0_5] : memref<16x32xf32, #tpu.memory_space<vmem>>, vector<16x32xf32>
    %11 = vector.shape_cast %10 : vector<16x32xf32> to vector<1x16x32xf32>
    %12 = vector.broadcast %11 : vector<1x16x32xf32> to vector<8x16x32xf32>
    %13 = arith.addf %2, %12 : vector<8x16x32xf32>
    %14 = vector.shape_cast %13 : vector<8x16x32xf32> to vector<128x32xf32>
    %15 = arith.truncf %14 : vector<128x32xf32> to vector<128x32xbf16>
    %c0_6 = arith.constant 0 : index
    %c0_7 = arith.constant 0 : index
    %16 = vector.load %arg4[%c0_6, %c0_7] : memref<32x32xbf16, #tpu.memory_space<vmem>>, vector<32x32xbf16>
    %cst_8 = arith.constant dense<0.000000e+00> : vector<8x32xf32>
    %17 = tpu.matmul %9, %16, %cst_8 {dimension_numbers = #tpu.dot_dimension_numbers<[1], [0], [0], [1], [0, 0, 1, 1], [], []>} : vector<8x32xbf16>, vector<32x32xbf16>, vector<8x32xf32> -> vector<8x32xf32>
    %c0_9 = arith.constant 0 : index
    %c0_10 = arith.constant 0 : index
    %18 = vector.load %arg5[%c0_9, %c0_10] : memref<1x32xf32, #tpu.memory_space<vmem>>, vector<1x32xf32>
    %19 = vector.broadcast %18 : vector<1x32xf32> to vector<8x32xf32>
    %20 = arith.addf %17, %19 : vector<8x32xf32>
    %cst_11 = arith.constant 0.353553385 : f32
    %21 = vector.broadcast %cst_11 : f32 to vector<8x32xf32>
    %22 = arith.mulf %20, %21 : vector<8x32xf32>
    %c0_12 = arith.constant 0 : index
    %c0_13 = arith.constant 0 : index
    %23 = vector.load %arg6[%c0_12, %c0_13] : memref<32x64xbf16, #tpu.memory_space<vmem>>, vector<32x64xbf16>
    %cst_14 = arith.constant dense<0.000000e+00> : vector<8x64xf32>
    %24 = tpu.matmul %9, %23, %cst_14 {dimension_numbers = #tpu.dot_dimension_numbers<[1], [0], [0], [1], [0, 0, 1, 1], [], []>} : vector<8x32xbf16>, vector<32x64xbf16>, vector<8x64xf32> -> vector<8x64xf32>
    %c0_15 = arith.constant 0 : index
    %c0_16 = arith.constant 0 : index
    %25 = vector.load %arg7[%c0_15, %c0_16] : memref<1x64xf32, #tpu.memory_space<vmem>>, vector<1x64xf32>
    %26 = vector.broadcast %25 : vector<1x64xf32> to vector<8x64xf32>
    %27 = arith.addf %24, %26 : vector<8x64xf32>
    %c0_17 = arith.constant 0 : index
    %c0_18 = arith.constant 0 : index
    %28 = vector.load %arg6[%c0_17, %c0_18] : memref<32x64xbf16, #tpu.memory_space<vmem>>, vector<32x64xbf16>
    %cst_19 = arith.constant dense<0.000000e+00> : vector<128x64xf32>
    %29 = tpu.matmul %15, %28, %cst_19 {dimension_numbers = #tpu.dot_dimension_numbers<[1], [0], [0], [1], [0, 0, 1, 1], [], []>} : vector<128x32xbf16>, vector<32x64xbf16>, vector<128x64xf32> -> vector<128x64xf32>
    %c0_20 = arith.constant 0 : index
    %c0_21 = arith.constant 0 : index
    %30 = vector.load %arg7[%c0_20, %c0_21] : memref<1x64xf32, #tpu.memory_space<vmem>>, vector<1x64xf32>
    %31 = vector.broadcast %30 : vector<1x64xf32> to vector<128x64xf32>
    %32 = arith.addf %29, %31 : vector<128x64xf32>
    %33 = vector.extract_strided_slice %27 {offsets = [0, 0], sizes = [8, 32], strides = [1, 1]} : vector<8x64xf32> to vector<8x32xf32>
    %34 = vector.extract_strided_slice %27 {offsets = [0, 32], sizes = [8, 32], strides = [1, 1]} : vector<8x64xf32> to vector<8x32xf32>
    %35 = vector.extract_strided_slice %32 {offsets = [0, 0], sizes = [128, 32], strides = [1, 1]} : vector<128x64xf32> to vector<128x32xf32>
    %36 = vector.extract_strided_slice %32 {offsets = [0, 32], sizes = [128, 32], strides = [1, 1]} : vector<128x64xf32> to vector<128x32xf32>
    %37 = arith.mulf %22, %33 : vector<8x32xf32>
    %c0_22 = arith.constant 0 : index
    %c0_23 = arith.constant 0 : index
    %38 = vector.load %arg10[%c0_22, %c0_23] : memref<32x4xf32, #tpu.memory_space<vmem>>, vector<32x4xf32>
    %cst_24 = arith.constant dense<0.000000e+00> : vector<8x4xf32>
    %39 = tpu.matmul %37, %38, %cst_24 {dimension_numbers = #tpu.dot_dimension_numbers<[1], [0], [0], [1], [0, 0, 1, 1], [], []>} : vector<8x32xf32>, vector<32x4xf32>, vector<8x4xf32> -> vector<8x4xf32>
    %40 = vector.shape_cast %35 : vector<128x32xf32> to vector<8x16x32xf32>
    %41 = vector.shape_cast %22 : vector<8x32xf32> to vector<8x1x32xf32>
    %42 = vector.broadcast %41 : vector<8x1x32xf32> to vector<8x16x32xf32>
    %43 = arith.mulf %40, %42 : vector<8x16x32xf32>
    %44 = vector.shape_cast %43 : vector<8x16x32xf32> to vector<128x32xf32>
    %c0_25 = arith.constant 0 : index
    %c0_26 = arith.constant 0 : index
    %45 = vector.load %arg10[%c0_25, %c0_26] : memref<32x4xf32, #tpu.memory_space<vmem>>, vector<32x4xf32>
    %cst_27 = arith.constant dense<0.000000e+00> : vector<128x4xf32>
    %46 = tpu.matmul %44, %45, %cst_27 {dimension_numbers = #tpu.dot_dimension_numbers<[1], [0], [0], [1], [0, 0, 1, 1], [], []>} : vector<128x32xf32>, vector<32x4xf32>, vector<128x4xf32> -> vector<128x4xf32>
    %47 = vector.shape_cast %46 : vector<128x4xf32> to vector<8x16x4xf32>
    %cst_28 = arith.constant dense<0xFF800000> : vector<8x4xf32>
    %48 = vector.multi_reduction <maximumf>, %47, %cst_28 [1] : vector<8x16x4xf32> to vector<8x4xf32>
    %49 = arith.maximumf %48, %39 : vector<8x4xf32>
    %50 = arith.subf %39, %49 : vector<8x4xf32>
    %51 = math.exp %50 : vector<8x4xf32>
    %52 = vector.shape_cast %49 : vector<8x4xf32> to vector<8x1x4xf32>
    %53 = vector.broadcast %52 : vector<8x1x4xf32> to vector<8x16x4xf32>
    %54 = arith.subf %47, %53 : vector<8x16x4xf32>
    %55 = math.exp %54 : vector<8x16x4xf32>
    %cst_29 = arith.constant dense<0.000000e+00> : vector<8x4xf32>
    %56 = vector.multi_reduction <add>, %55, %cst_29 [1] : vector<8x16x4xf32> to vector<8x4xf32>
    %57 = arith.addf %51, %56 : vector<8x4xf32>
    %58 = tpu.reciprocal %57 : vector<8x4xf32> -> vector<8x4xf32>
    %59 = vector.shape_cast %55 : vector<8x16x4xf32> to vector<128x4xf32>
    %c0_30 = arith.constant 0 : index
    %c0_31 = arith.constant 0 : index
    %60 = vector.load %arg11[%c0_30, %c0_31] : memref<4x32xf32, #tpu.memory_space<vmem>>, vector<4x32xf32>
    %cst_32 = arith.constant dense<0.000000e+00> : vector<128x32xf32>
    %61 = tpu.matmul %59, %60, %cst_32 {dimension_numbers = #tpu.dot_dimension_numbers<[1], [0], [0], [1], [0, 0, 1, 1], [], []>} : vector<128x4xf32>, vector<4x32xf32>, vector<128x32xf32> -> vector<128x32xf32>
    %62 = arith.mulf %61, %36 : vector<128x32xf32>
    %63 = vector.shape_cast %62 : vector<128x32xf32> to vector<8x16x32xf32>
    %cst_33 = arith.constant dense<0.000000e+00> : vector<8x32xf32>
    %64 = vector.multi_reduction <add>, %63, %cst_33 [1] : vector<8x16x32xf32> to vector<8x32xf32>
    %c0_34 = arith.constant 0 : index
    %c0_35 = arith.constant 0 : index
    %65 = vector.load %arg11[%c0_34, %c0_35] : memref<4x32xf32, #tpu.memory_space<vmem>>, vector<4x32xf32>
    %cst_36 = arith.constant dense<0.000000e+00> : vector<8x32xf32>
    %66 = tpu.matmul %51, %65, %cst_36 {dimension_numbers = #tpu.dot_dimension_numbers<[1], [0], [0], [1], [0, 0, 1, 1], [], []>} : vector<8x4xf32>, vector<4x32xf32>, vector<8x32xf32> -> vector<8x32xf32>
    %67 = arith.mulf %66, %34 : vector<8x32xf32>
    %68 = arith.addf %64, %67 : vector<8x32xf32>
    %c0_37 = arith.constant 0 : index
    %c0_38 = arith.constant 0 : index
    %69 = vector.load %arg11[%c0_37, %c0_38] : memref<4x32xf32, #tpu.memory_space<vmem>>, vector<4x32xf32>
    %cst_39 = arith.constant dense<0.000000e+00> : vector<8x32xf32>
    %70 = tpu.matmul %58, %69, %cst_39 {dimension_numbers = #tpu.dot_dimension_numbers<[1], [0], [0], [1], [0, 0, 1, 1], [], []>} : vector<8x4xf32>, vector<4x32xf32>, vector<8x32xf32> -> vector<8x32xf32>
    %71 = arith.mulf %68, %70 : vector<8x32xf32>
    %72 = arith.truncf %71 : vector<8x32xf32> to vector<8x32xbf16>
    %c0_40 = arith.constant 0 : index
    %c0_41 = arith.constant 0 : index
    %73 = vector.load %arg8[%c0_40, %c0_41] : memref<32x128xbf16, #tpu.memory_space<vmem>>, vector<32x128xbf16>
    %cst_42 = arith.constant dense<0.000000e+00> : vector<8x128xf32>
    %74 = tpu.matmul %72, %73, %cst_42 {dimension_numbers = #tpu.dot_dimension_numbers<[1], [0], [0], [1], [0, 0, 1, 1], [], []>} : vector<8x32xbf16>, vector<32x128xbf16>, vector<8x128xf32> -> vector<8x128xf32>
    %c0_43 = arith.constant 0 : index
    %c0_44 = arith.constant 0 : index
    %75 = vector.load %arg9[%c0_43, %c0_44] : memref<1x128xf32, #tpu.memory_space<vmem>>, vector<1x128xf32>
    %76 = vector.broadcast %75 : vector<1x128xf32> to vector<8x128xf32>
    %77 = arith.addf %74, %76 : vector<8x128xf32>
    %c0_45 = arith.constant 0 : index
    %c0_46 = arith.constant 0 : index
    %78 = vector.load %arg12[%c0_45, %c0_46] : memref<8x128xf32, #tpu.memory_space<vmem>>, vector<8x128xf32>
    tpu.vector_store %arg12[%c0_45, %c0_46], %77 {strides = array<i32>} : memref<8x128xf32, #tpu.memory_space<vmem>>, vector<8x128xf32>,
    return
  }
  func.func @transform_0(%arg0: i32) -> (i32, i32) {
    %c0_i32 = arith.constant 0 : i32
    %c0_i32_0 = arith.constant 0 : i32
    return %arg0, %c0_i32 : i32, i32
  }
  func.func @transform_1(%arg0: i32) -> (i32, i32) {
    %c0_i32 = arith.constant 0 : i32
    %c0_i32_0 = arith.constant 0 : i32
    %c0_i32_1 = arith.constant 0 : i32
    return %c0_i32, %c0_i32_0 : i32, i32
  }
  func.func @transform_2(%arg0: i32) -> (i32, i32) {
    %c0_i32 = arith.constant 0 : i32
    %c0_i32_0 = arith.constant 0 : i32
    %c0_i32_1 = arith.constant 0 : i32
    return %c0_i32, %c0_i32_0 : i32, i32
  }
  func.func @transform_3(%arg0: i32) -> (i32, i32) {
    %c0_i32 = arith.constant 0 : i32
    %c0_i32_0 = arith.constant 0 : i32
    %c0_i32_1 = arith.constant 0 : i32
    return %c0_i32, %c0_i32_0 : i32, i32
  }
  func.func @transform_4(%arg0: i32) -> (i32, i32) {
    %c0_i32 = arith.constant 0 : i32
    %c0_i32_0 = arith.constant 0 : i32
    %c0_i32_1 = arith.constant 0 : i32
    return %c0_i32, %c0_i32_0 : i32, i32
  }
  func.func @transform_5(%arg0: i32) -> (i32, i32) {
    %c0_i32 = arith.constant 0 : i32
    %c0_i32_0 = arith.constant 0 : i32
    %c0_i32_1 = arith.constant 0 : i32
    return %c0_i32, %c0_i32_0 : i32, i32
  }
  func.func @transform_6(%arg0: i32) -> (i32, i32) {
    %c0_i32 = arith.constant 0 : i32
    %c0_i32_0 = arith.constant 0 : i32
    %c0_i32_1 = arith.constant 0 : i32
    return %c0_i32, %c0_i32_0 : i32, i32
  }
  func.func @transform_7(%arg0: i32) -> (i32, i32) {
    %c0_i32 = arith.constant 0 : i32
    %c0_i32_0 = arith.constant 0 : i32
    %c0_i32_1 = arith.constant 0 : i32
    return %c0_i32, %c0_i32_0 : i32, i32
  }
  func.func @transform_8(%arg0: i32) -> (i32, i32) {
    %c0_i32 = arith.constant 0 : i32
    %c0_i32_0 = arith.constant 0 : i32
    %c0_i32_1 = arith.constant 0 : i32
    return %c0_i32, %c0_i32_0 : i32, i32
  }
  func.func @transform_9(%arg0: i32) -> (i32, i32) {
    %c0_i32 = arith.constant 0 : i32
    %c0_i32_0 = arith.constant 0 : i32
    %c0_i32_1 = arith.constant 0 : i32
    return %c0_i32, %c0_i32_0 : i32, i32
  }
  func.func @transform_10(%arg0: i32) -> (i32, i32) {
    %c0_i32 = arith.constant 0 : i32
    %c0_i32_0 = arith.constant 0 : i32
    %c0_i32_1 = arith.constant 0 : i32
    return %c0_i32, %c0_i32_0 : i32, i32
  }
  func.func @transform_11(%arg0: i32) -> (i32, i32) {
    %c0_i32 = arith.constant 0 : i32
    %c0_i32_0 = arith.constant 0 : i32
    return %arg0, %c0_i32 : i32, i32
  }
}

</mosaic_0001>

<bundles_post_ra>
// kernel: tpu_custom_call.1
= control target key start
LH: loop header
LB: loop body
LE: loop exit
PB: predicated region body
PF: predicated region fallthrough
CT: control target
= control target key end

     0   :  { %v2185_v1 = vmov 0.0   ;;  %vm2186_vm0 = vmmov 0   ;;  %vm72_vm1 = vcmask 261120   ;;  %s2762_s0 = inlined_call_operand.vmem [shape: bf16[128,32], index: 0, kind: input, shape index: {}]   ;;  %s2763_s1 = inlined_call_operand.vmem [shape: f32[1,32], index: 1, kind: input, shape index: {}]   ;;  %s2764_s2 = inlined_call_operand.vmem [shape: f32[16,32], index: 2, kind: input, shape index: {}]   ;;  %s2765_s3 = inlined_call_operand.vmem [shape: bf16[32,32], index: 3, kind: input, shape index: {}]   ;;  %s2766_s4 = inlined_call_operand.vmem [shape: f32[1,32], index: 4, kind: input, shape index: {}]   ;;  %s2767_s5 = inlined_call_operand.vmem [shape: bf16[32,64], index: 5, kind: input, shape index: {}]   ;;  %s2768_s6 = inlined_call_operand.vmem [shape: f32[1,64], index: 6, kind: input, shape index: {}]   ;;  %s2769_s7 = inlined_call_operand.vmem [shape: bf16[32,128], index: 7, kind: input, shape index: {}]   ;;  %s2770_s8 = inlined_call_operand.vmem [shape: f32[1,128], index: 8, kind: input, shape index: {}]   ;;  %s2771_s9 = inlined_call_operand.vmem [shape: f32[32,4], index: 9, kind: input, shape index: {}]   ;;  %s2772_s10 = inlined_call_operand.vmem [shape: f32[4,32], index: 10, kind: input, shape index: {}]   ;;  %s2773_s11 = inlined_call_operand.hbm [shape: f32[8,128], index: 11, kind: output, shape index: {}]  }
   0x1   :  { %v2121_v0 = vld [vmem:[%s2765_s3 + $0x8] sm:$0xff]   ;;  %1993 = vmatprep.subr.bf16.mxu0 %v2185_v1  ;;  %2001 = vmatprep.subr.bf16.mxu1 %v2185_v1  ;;  %v2123_v3 = vld [vmem:[%s2765_s3] sm:$0xff]   ;;  %v2286_v7 = vld [vmem:[%s2762_s0 + $0x10] sm:$0xff]  }
   0x2   :  { %v2258_v2 = vld [vmem:[%s2767_s5 + $0x8] sm:$0xff]   ;;  %1994 = vmatpush3.bf16.msra.mxu0 %v2121_v0  ;;  %1997 = vmatprep.mubr.msk.bf16.mxu0 %vm2186_vm0, %v2185_v1  ;;  %v2270_v4 = vld [vmem:[%s2767_s5] sm:$0xff]   ;;  %v2297_v12 = vld [vmem:[%s2762_s0 + $0x18] sm:$0xff]   ;;  %v1899_v15 = vunpack.c.l.bf16 %v2286_v7  ;;  %v1900_v16 = vunpack.c.h.bf16 %v2286_v7 }
   0x3   :  { %2002 = vmatpush3.bf16.msra.mxu1 %v2258_v2  ;;  %1995 = vmatprep.subr.bf16.mxu0 %v2185_v1  ;;  %v2276_v5 = vld [vmem:[%s2762_s0] sm:$0xff]   ;;  %v2281_v6 = vld [vmem:[%s2762_s0 + $0x8] sm:$0xff]   ;;  %v1903_v17 = vunpack.c.l.bf16 %v2297_v12  ;;  %v1904_v18 = vunpack.c.h.bf16 %v2297_v12  ;;  %v2316_v19 = vld [vmem:[%s2762_s0 + $0x30] sm:$0xff]  }
   0x4   :  { %2003 = vmatprep.subr.bf16.mxu1 %v2185_v1  ;;  %2005 = vmatprep.mubr.msk.bf16.mxu1 %vm2186_vm0, %v2185_v1  ;;  %v1891_v8 = vunpack.c.l.bf16 %v2276_v5  ;;  %v1892_v9 = vunpack.c.h.bf16 %v2276_v5  ;;  %v1895_v10 = vunpack.c.l.bf16 %v2281_v6  ;;  %v1896_v11 = vunpack.c.h.bf16 %v2281_v6  ;;  %v2302_v13 = vld [vmem:[%s2762_s0 + $0x20] sm:$0xff]   ;;  %v2307_v14 = vld [vmem:[%s2762_s0 + $0x28] sm:$0xff]   ;;  %v2321_v20 = vld [vmem:[%s2762_s0 + $0x38] sm:$0xff]  }
   0x5   :  { %v1907_v21 = vunpack.c.l.bf16 %v2302_v13  ;;  %v1908_v22 = vunpack.c.h.bf16 %v2302_v13  ;;  %v1911_v23 = vunpack.c.l.bf16 %v2307_v14  ;;  %v1912_v24 = vunpack.c.h.bf16 %v2307_v14 }
   0x6   :  { %1996 = vmatpush3.bf16.msra.mxu0 %v2123_v3  ;;  %v1915_v25 = vunpack.c.l.bf16 %v2316_v19  ;;  %v1916_v26 = vunpack.c.h.bf16 %v2316_v19  ;;  %v1919_v27 = vunpack.c.l.bf16 %v2321_v20  ;;  %v1920_v28 = vunpack.c.h.bf16 %v2321_v20 }
   0x7   :  { %2004 = vmatpush3.bf16.msra.mxu1 %v2270_v4  ;;  %2009 = vmatprep.subr.bf16.mxu0 %v2258_v2  ;;  %v73_v29 = vsel %vm72_vm1, %v1891_v8, 0.0  ;;  %v74_v30 = vsel %vm72_vm1, %v1892_v9, 0.0  ;;  %v82_v31 = vsel %vm72_vm1, %v1895_v10, 0.0  ;;  %v83_v32 = vsel %vm72_vm1, %v1896_v11, 0.0 }
   0x8   :  { %2029 = vmatprep.subr.mxu1 %v2185_v1  ;;  %v75_v33 = vadd.f32 %v74_v30, %v73_v29  ;;  %v84_v34 = vadd.f32 %v83_v32, %v82_v31  ;;  %v91_v35 = vsel %vm72_vm1, %v1899_v15, 0.0  ;;  %v92_v36 = vsel %vm72_vm1, %v1900_v16, 0.0 }
   0x9   :  { %16 = vsyncpa [#allocation3], 0  ;;  %v93_v37 = vadd.f32 %v92_v36, %v91_v35  ;;  %v100_v38 = vsel %vm72_vm1, %v1903_v17, 0.0  ;;  %v101_v39 = vsel %vm72_vm1, %v1904_v18, 0.0  ;;  %v109_v40 = vsel %vm72_vm1, %v1907_v21, 0.0  ;;  %v495_v19 = vld [vmem:[%s2771_s9 + $0x18] sm:$0xff] }
   0xa   :  { %v76_v41 = vrot.slane %v75_v33, 4  ;;  %v85_v42 = vrot.slane %v84_v34, 4  ;;  %v102_v43 = vadd.f32 %v101_v39, %v100_v38  ;;  %v110_v44 = vsel %vm72_vm1, %v1908_v22, 0.0  ;;  %v493_v20 = vld [vmem:[%s2771_s9 + $0x8] sm:$0xff]  ;;  %s2189_s18 = smov [#allocation2]  }
   0xb   :  { %v94_v45 = vrot.slane %v93_v37, 4  ;;  %v111_v46 = vadd.f32 %v110_v44, %v109_v40  ;;  %v118_v47 = vsel %vm72_vm1, %v1911_v23, 0.0  ;;  %v119_v48 = vsel %vm72_vm1, %v1912_v24, 0.0  ;;  %s1822_s19 = sshll.u32 %s2189_s18, 4  ;;  %s1823_s19 = int_to_ptr.vmem [resolvable:$true] %s1822_s19 }
   0xc   :  { %v77_v49 = vadd.f32 %v76_v41, %v75_v33  ;;  %v86_v50 = vadd.f32 %v85_v42, %v84_v34  ;;  %v103_v51 = vrot.slane %v102_v43, 4  ;;  %v120_v52 = vadd.f32 %v119_v48, %v118_v47  ;;  %s2163_s0 = scalar_lea.vmem %s1823_s19, 128  ;;  %p2168_p1 = scmp.lt.s32.totalorder %s1823_s19, %s1823_s19 }
   0xd   :  { %v95_v53 = vadd.f32 %v94_v45, %v93_v37  ;;  %v112_v54 = vrot.slane %v111_v46, 4  ;;  %v127_v55 = vsel %vm72_vm1, %v1915_v25, 0.0  ;;  %v128_v56 = vsel %vm72_vm1, %v1916_v26, 0.0  ;;  %p2164_p0 = scmp.ne.s32.totalorder %s1823_s19, %s2163_s0  ;;  %p2169_p2 = scmp.lt.s32.totalorder %s2163_s0, %s2163_s0 }
   0xe   :  { %v78_v57 = vrot.slane %v77_v49, 2  ;;  %v87_v58 = vrot.slane %v86_v50, 2  ;;  %v104_v59 = vadd.f32 %v103_v51, %v102_v43  ;;  %v121_v60 = vrot.slane %v120_v52, 4 }
   0xf   :  { %v96_v61 = vrot.slane %v95_v53, 2  ;;  %v113_v62 = vadd.f32 %v112_v54, %v111_v46  ;;  %v129_v63 = vadd.f32 %v128_v56, %v127_v55  ;;  %v136_v0 = vsel %vm72_vm1, %v1919_v27, 0.0  ;;  %p2170_p3 = por %p2169_p2, %p2168_p1 }
  0x10   :  { %v79_v3 = vadd.f32 %v78_v57, %v77_v49  ;;  %v88_v29 = vadd.f32 %v87_v58, %v86_v50  ;;  %v105_v30 = vrot.slane %v104_v59, 2  ;;  %v122_v31 = vadd.f32 %v121_v60, %v120_v52  ;;  %v1830_v52 = vld [vmem:[%s2763_s1] ss:$0 sm:$0xff] }
  0x11   :  { %v97_v32 = vadd.f32 %v96_v61, %v95_v53  ;;  %v114_v33 = vrot.slane %v113_v62, 2  ;;  %v130_v34 = vrot.slane %v129_v63, 4  ;;  %v137_v35 = vsel %vm72_vm1, %v1920_v28, 0.0  ;;  %p2171_p4 = pnand %p2170_p3, %p2164_p0 }
  0x12   :  { %v80_v36 = vrot.slane %v79_v3, 1  ;;  %v89_v37 = vrot.slane %v88_v29, 1  ;;  %v106_v38 = vadd.f32 %v105_v30, %v104_v59  ;;  %v123_v39 = vrot.slane %v122_v31, 2 }
  0x13   :  { %v98_v40 = vrot.slane %v97_v32, 1  ;;  %v115_v41 = vadd.f32 %v114_v33, %v113_v62  ;;  %v131_v42 = vadd.f32 %v130_v34, %v129_v63  ;;  %v138_v43 = vadd.f32 %v137_v35, %v136_v0 }
  0x14   :  { %v81_v44 = vadd.f32 %v80_v36, %v79_v3  ;;  %v90_v45 = vadd.f32 %v89_v37, %v88_v29  ;;  %v107_v46 = vrot.slane %v106_v38, 1  ;;  %v124_v47 = vadd.f32 %v123_v39, %v122_v31 }
  0x15   :  { %v99_v48 = vadd.f32 %v98_v40, %v97_v32  ;;  %v116_v49 = vrot.slane %v115_v41, 1  ;;  %v132_v50 = vrot.slane %v131_v42, 2  ;;  %v139_v51 = vrot.slane %v138_v43, 4 }
  0x16   :  { %vm230_vm2 = vcmask 1041409   ;;  %v108_v53 = vadd.f32 %v107_v46, %v106_v38  ;;  %v125_v54 = vrot.slane %v124_v47, 1  ;;  %v145_v55 = vmul.f32 0.0625, %v81_v44 }
  0x17   :  { %v146_v56 = vmul.f32 0.0625, %v90_v45  ;;  %vm233_vm3 = vcmask 1042434   ;;  %v117_v57 = vadd.f32 %v116_v49, %v115_v41  ;;  %v133_v58 = vadd.f32 %v132_v50, %v131_v42 }
  0x18   :  { %v140_v59 = vadd.f32 %v139_v51, %v138_v43  ;;  %v147_v60 = vmul.f32 0.0625, %v99_v48  ;;  %v126_v61 = vadd.f32 %v125_v54, %v124_v47  ;;  %v148_v62 = vmul.f32 0.0625, %v108_v53 }
  0x19   :  { %v160_v63 = vadd.f32 %v1830_v52, %v145_v55  ;;  %v161_v0 = vadd.f32 %v1830_v52, %v146_v56  ;;  %v134_v3 = vrot.slane %v133_v58, 1  ;;  %v149_v30 = vmul.f32 0.0625, %v117_v57 }
  0x1a   :  { %v141_v29 = vrot.slane %v140_v59, 2  ;;  %v162_v31 = vadd.f32 %v1830_v52, %v147_v60  ;;  %v150_v32 = vmul.f32 0.0625, %v126_v61  ;;  %v163_v33 = vadd.f32 %v1830_v52, %v148_v62 }
  0x1b   :  { %v168_v34 = vpack.c.bf16 %v160_v63, %v160_v63  ;;  %v169_v35 = vpack.c.bf16 %v161_v0, %v161_v0  ;;  %v135_v36 = vadd.f32 %v134_v3, %v133_v58  ;;  %v164_v38 = vadd.f32 %v1830_v52, %v149_v30 }
  0x1c   :  { %v142_v37 = vadd.f32 %v141_v29, %v140_v59  ;;  %v170_v39 = vpack.c.bf16 %v162_v31, %v162_v31  ;;  %v165_v40 = vadd.f32 %v1830_v52, %v150_v32  ;;  %v171_v41 = vpack.c.bf16 %v163_v33, %v163_v33  ;;  %v176_v31 = vld [vmem:[%s2764_s2] sm:$0xff]  ;;  %v177_v32 = vld [vmem:[%s2764_s2 + $0x8] sm:$0xff] }
  0x1d   :  { %v221_v42 = vunpack.c.l.b16 %v168_v34  ;;  %v222_v43 = vunpack.c.l.b16 %v169_v35  ;;  %v151_v45 = vmul.f32 0.0625, %v135_v36  ;;  %v172_v46 = vpack.c.bf16 %v164_v38, %v164_v38 }
  0x1e   :  { %v143_v44 = vrot.slane %v142_v37, 1  ;;  %v223_v47 = vunpack.c.l.b16 %v170_v39  ;;  %v173_v48 = vpack.c.bf16 %v165_v40, %v165_v40  ;;  %v224_v49 = vunpack.c.l.b16 %v171_v41 }
  0x1f   :  { %v229_v50 = vrot.slane %v222_v43, 7  ;;  %vm236_vm4 = vcmask 1043459   ;;  %v166_v53 = vadd.f32 %v1830_v52, %v151_v45  ;;  %v225_v54 = vunpack.c.l.b16 %v172_v46 }
  0x20   :  { %v144_v51 = vadd.f32 %v143_v44, %v142_v37  ;;  %v232_v55 = vrot.slane %v223_v47, 6  ;;  %v226_v56 = vunpack.c.l.b16 %v173_v48  ;;  %v235_v58 = vrot.slane %v224_v49, 5  ;;  %v1831_v47 = vld [vmem:[%s2766_s4] ss:$0 sm:$0xff]  ;;  %s2188_s4 = smov 96  }
  0x21   :  { %v231_v57 = vsel %vm230_vm2, %v229_v50, %v221_v42  ;;  %vm239_vm5 = vcmask 1044484   ;;  %v174_v60 = vpack.c.bf16 %v166_v53, %v166_v53  ;;  %v238_v62 = vrot.slane %v225_v54, 4  ;;  %v2466_v48 = vld [vmem:[%s2768_s6] ss:$0 sm:$0xff] }
  0x22   :  { %v152_v59 = vmul.f32 0.0625, %v144_v51  ;;  %v234_v61 = vsel %vm233_vm3, %v232_v55, %v231_v57  ;;  %v241_v0 = vrot.slane %v226_v56, 3  ;;  %vm242_vm6 = vcmask 1045509  }
  0x23   :  { %v237_v63 = vsel %vm236_vm4, %v235_v58, %v234_v61  ;;  %v227_v29 = vunpack.c.l.b16 %v174_v60  ;;  %vm245_vm7 = vcmask 1046534   ;;  %v179_v37 = vadd.f32 %v1892_v9, %v177_v32 }
  0x24   :  { %v167_v3 = vadd.f32 %v1830_v52, %v152_v59  ;;  %v240_v30 = vsel %vm239_vm5, %v238_v62, %v237_v63  ;;  %v178_v52 = vadd.f32 %v1891_v8, %v176_v31  ;;  %vm248_vm8 = vcmask 1047559  }
  0x25   :  { %v243_v34 = vsel %vm242_vm6, %v241_v0, %v240_v30  ;;  %v244_v35 = vrot.slane %v227_v29, 2  ;;  %v180_v43 = vadd.f32 %v1895_v10, %v176_v31  ;;  %v181_v8 = vadd.f32 %v1896_v11, %v177_v32 }
  0x26   :  { %v175_v33 = vpack.c.bf16 %v167_v3, %v167_v3  ;;  %v194_v41 = vpack.c.bf16 %v179_v37, %v178_v52  ;;  %v182_v5 = vadd.f32 %v1899_v15, %v176_v31  ;;  %v183_v9 = vadd.f32 %v1900_v16, %v177_v32 }
  0x27   :  { %v246_v38 = vsel %vm245_vm7, %v244_v35, %v243_v34  ;;  %v195_v44 = vpack.c.bf16 %v181_v8, %v180_v43  ;;  %v185_v10 = vadd.f32 %v1904_v18, %v177_v32  ;;  %v186_v7 = vadd.f32 %v1907_v21, %v176_v31 }
  0x28   :  { %v228_v36 = vunpack.c.l.b16 %v175_v33  ;;  %v196_v6 = vpack.c.bf16 %v183_v9, %v182_v5  ;;  %v187_v11 = vadd.f32 %v1908_v22, %v177_v32  ;;  %v190_v12 = vadd.f32 %v1915_v25, %v176_v31  ;;  %v492_v25 = vld [vmem:[%s2771_s9] sm:$0xff] }
  0x29   :  { %v191_v18 = vadd.f32 %v1916_v26, %v177_v32  ;;  %v192_v22 = vadd.f32 %v1919_v27, %v176_v31  ;;  %v2187_v26 = vmov 1966171168   ;;  %vm1210_vm9 = vcmask 1043456  }
  0x2a   :  { %v247_v39 = vrot.slane %v228_v36, 1  ;;  %v198_v16 = vpack.c.bf16 %v187_v11, %v186_v7  ;;  %v572_v27 = vunpack.c.l.s4 %v2187_v26  ;;  %vm868_vm10 = vcmask 31744  }
  0x2b   :  { %v200_v21 = vpack.c.bf16 %v191_v18, %v190_v12 }
  0x2c   :  { %v249_v40 = vsel %vm248_vm8, %v247_v39, %v246_v38  ;;  %v573_v45 = vunpack.c.0.s8 %v572_v27 }
  0x2d   :  { %v250_v42 = vpack.c.b16 %v249_v40, %v249_v40 }
  0x2f   :  { %1998 = vmatmul.mubr.msk.bf16.vlgmr.msra.gmra.mxu0 %vm72_vm1, %v250_v42  ;;  %2006 = vmatmul.mubr.msk.bf16.vlgmr.msra.gmra.mxu1 %vm72_vm1, %v250_v42 }
  0x30   :  { %2010 = vmatpush3.bf16.msra.mxu0 %v2258_v2  ;;  %2013 = vmatprep.mubr.msk.bf16.mxu0 %vm72_vm1, %v194_v41  ;;  %v184_v2 = vadd.f32 %v1903_v17, %v176_v31  ;;  %v189_v17 = vadd.f32 %v1912_v24, %v177_v32  ;;  %v494_v24 = vld [vmem:[%s2771_s9 + $0x10] sm:$0xff] }
  0x31   :  { %2011 = vmatprep.subr.bf16.mxu0 %v2270_v4  ;;  %2037 = vmatprep.mubr.msk.f32.mxu1 %vm2186_vm0, %v2185_v1 }
  0x32   :  { %v197_v15 = vpack.c.bf16 %v185_v10, %v184_v2  ;;  %2030 = vmatpush3.msra.mxu1 %v495_v19 }
  0x33   :  { %2031 = vmatprep.subr.mxu1 %v2185_v1 }
  0x34   :  { %2012 = vmatpush3.bf16.msra.mxu0 %v2270_v4  ;;  %v188_v4 = vadd.f32 %v1911_v23, %v176_v31  ;;  %v193_v23 = vadd.f32 %v1920_v28, %v177_v32  ;;  %2032 = vmatpush3.msra.mxu1 %v494_v24  ;;  %v574_v28 = vlaneseq }
  0x35   :  { %2033 = vmatprep.subr.mxu1 %v2185_v1 }
  0x36   :  { %v199_v13 = vpack.c.bf16 %v189_v17, %v188_v4  ;;  %v201_v14 = vpack.c.bf16 %v193_v23, %v192_v22  ;;  %2034 = vmatpush3.msra.mxu1 %v493_v20  ;;  %v575_v46 = vshrl.u32 %v574_v28, 7 }
  0x37   :  { %2014 = vmatmul.mubr.msk.bf16.vlgmr.msra.gmra.mxu0 %vm72_vm1, %v195_v44  ;;  %2035 = vmatprep.subr.mxu1 %v2185_v1 }
  0x38   :  { %2017 = vmatprep.mubr.msk.bf16.mxu0 %vm72_vm1, %v196_v6  ;;  %2036 = vmatpush3.msra.mxu1 %v492_v25  ;;  %v2468_v53 = vsub.s32 %v573_v45, %v575_v46  ;;  %v2475_v3 = vsub.s32 0, %v575_v46 }
  0x39   :  { %2040 = vmatprep.subr.mxu1 %v495_v19 }
  0x3f   :  { %2018 = vmatmul.mubr.msk.bf16.gmra.mxu0 %vm72_vm1, %v197_v15 }
  0x40   :  { %2021 = vmatprep.mubr.msk.bf16.mxu0 %vm72_vm1, %v198_v16 }
  0x47   :  { %2022 = vmatmul.mubr.msk.bf16.gmra.mxu0 %vm72_vm1, %v199_v13 }
  0x48   :  { %2025 = vmatprep.mubr.msk.bf16.mxu0 %vm72_vm1, %v200_v21 }
  0x4f   :  { %2026 = vmatmul.mubr.msk.bf16.gmra.mxu0 %vm72_vm1, %v201_v14 }
  0xef   :  { %v300_v49 = vpop.f32.mrf.mxu0  ;;  %v364_v50 = vpop.f32.mrf.mxu1 }
  0xf0   :  { %v301_v51 = vadd.f32 %v1831_v47, %v300_v49  ;;  %v2471_v54 = vadd.f32 %v2466_v48, %v364_v50 }
  0xf1   :  { %v1999_v55 = vpop.f32.mrf.mxu0  ;;  %v2007_v56 = vpop.f32.mrf.mxu1 }
  0xf2   :  { %v306_v57 = vmul.f32 0.35355338, %v301_v51 }
  0xf3   :  { %v303_v58 = vpop.f32.mrf.mxu0  ;;  %v367_v59 = vpop.f32.mrf.mxu1 }
  0xf4   :  { %v577_v60 = vrot.slane %v306_v57, %v2468_v53  ;;  %v491_v61 = vmul.f32 %v2471_v54, %v306_v57  ;;  %v570_v39 = vcombine.high %v306_v57, %v306_v57 }
  0xf5   :  { %v2000_v62 = vpop.f32.mrf.mxu0  ;;  %v2008_v63 = vpop.f32.mrf.mxu1 }
  0xf6   :  { %v585_v0 = vcombine.high %v577_v60, %v577_v60  ;;  %2038 = vmatmul.mubr.msk.f32.vlgmr.msra.gmra.mxu1 %vm72_vm1, %v491_v61  ;;  %v593_v29 = vrot.slane %v577_v60, %v2468_v53  ;;  %v584_v44 = vrot.slane %v570_v39, %v2468_v53 }
  0xf7   :  { %v2015_v30 = vpop.f32.mrf.mxu0  ;;  %2041 = vmatpush3.msra.mxu1 %v495_v19 }
  0xf8   :  { %v437_v31 = vadd.f32 %v2015_v30, %v2466_v48  ;;  %2042 = vmatprep.subr.mxu1 %v494_v24  ;;  %v607_v32 = vrot.slane %v585_v0, %v2468_v53  ;;  %v622_v35 = vrot.slane %v593_v29, %v2475_v3  ;;  %v615_v41 = vcombine.high %v593_v29, %v593_v29 }
  0xf9   :  { %v428_v33 = vpop.f32.mrf.mxu0  ;;  %2043 = vmatpush3.msra.mxu1 %v494_v24  ;;  %v600_v18 = vrot.slane %v584_v44, %v2468_v53  ;;  %v586_v22 = vcombine.high %v584_v44, %v584_v44 }
  0xfa   :  { %v429_v34 = vadd.f32 %v2466_v48, %v428_v33  ;;  %1379 = vrot.lane.b32.xlu0 %v437_v31, %s2188_s4  ;;  %2044 = vmatprep.subr.mxu1 %v493_v20  ;;  %v626_v37 = vrot.slane %v607_v32, %v2475_v3  ;;  %v630_v2 = vrot.slane %v615_v41, %v2475_v3 }
  0xfb   :  { %v2016_v36 = vpop.f32.mrf.mxu0  ;;  %2045 = vmatpush3.msra.mxu1 %v493_v20  ;;  %v617_v10 = vcombine.high %v607_v32, %v607_v32  ;;  %v614_v26 = vrot.slane %v586_v22, %v2468_v53  ;;  %v616_v50 = vcombine.high %v600_v18, %v600_v18 }
  0xfc   :  { %v659_v52 = vmul.f32 %v622_v35, %v429_v34  ;;  %2046 = vmatprep.subr.mxu1 %v492_v25  ;;  %v440_v43 = vadd.f32 %v2016_v36, %v2466_v48  ;;  %v661_v5 = vmul.f32 %v626_v37, %v437_v31 }
  0xfd   :  { %v431_v38 = vpop.f32.mrf.mxu0  ;;  %2047 = vmatpush3.msra.mxu1 %v492_v25  ;;  %v634_v13 = vrot.slane %v617_v10, %v2475_v3  ;;  %v638_v25 = vrot.slane %v600_v18, %v2475_v3  ;;  %v642_v51 = vrot.slane %v614_v26, %v2475_v3  ;;  %v646_v59 = vrot.slane %v616_v50, %v2475_v3 }
  0xfe   :  { %v432_v40 = vadd.f32 %v2466_v48, %v431_v38  ;;  %1375 = vrot.lane.b32.xlu0 %v429_v34, %s2188_s4  ;;  %2048 = vmatprep.mubr.msk.f32.mxu1 %vm72_vm1, %v659_v52  ;;  %v662_v11 = vmul.f32 %v626_v37, %v440_v43  ;;  %v618_v60 = vcombine.high %v614_v26, %v614_v26 }
  0xff   :  { %v2019_v42 = vpop.f32.mrf.mxu0  ;;  %2098 = vmatprep.subr.mxu1 %v2185_v1 }
 0x100   :  { %v660_v8 = vmul.f32 %v622_v35, %v432_v40  ;;  %1377 = vrot.lane.b32.xlu1 %v432_v40, %s2188_s4  ;;  %v453_v15 = vadd.f32 %v2019_v42, %v2466_v48  ;;  %v650_v31 = vrot.slane %v618_v60, %v2475_v3 }
 0x101   :  { %v444_v9 = vpop.f32.mrf.mxu0 }
 0x102   :  { %v445_v6 = vadd.f32 %v2466_v48, %v444_v9  ;;  %1381 = vrot.lane.b32.xlu0 %v440_v43, %s2188_s4  ;;  %2049 = vmatmul.mubr.msk.f32.vlgmr.msra.gmra.mxu1 %vm72_vm1, %v660_v8  ;;  %v665_v19 = vmul.f32 %v634_v13, %v453_v15 }
 0x103   :  { %v2020_v7 = vpop.f32.mrf.mxu0  ;;  %2051 = vmatprep.mubr.msk.f32.mxu1 %vm72_vm1, %v661_v5 }
 0x104   :  { %v663_v16 = vmul.f32 %v630_v2, %v445_v6  ;;  %1383 = vrot.lane.b32.xlu1 %v445_v6, %s2188_s4  ;;  %v456_v17 = vadd.f32 %v2020_v7, %v2466_v48 }
 0x105   :  { %v447_v4 = vpop.f32.mrf.mxu0 }
 0x106   :  { %v448_v12 = vadd.f32 %v2466_v48, %v447_v4  ;;  %1387 = vrot.lane.b32.xlu0 %v453_v15, %s2188_s4  ;;  %2052 = vmatmul.mubr.msk.f32.gmra.mxu1 %vm72_vm1, %v662_v11  ;;  %v666_v28 = vmul.f32 %v634_v13, %v456_v17 }
 0x107   :  { %v2023_v21 = vpop.f32.mrf.mxu0  ;;  %2054 = vmatprep.mubr.msk.f32.mxu1 %vm72_vm1, %v663_v16 }
 0x108   :  { %v664_v23 = vmul.f32 %v630_v2, %v448_v12  ;;  %v469_v14 = vadd.f32 %v2023_v21, %v2466_v48  ;;  %1389 = vrot.lane.b32.xlu1 %v456_v17, %s2188_s4 }
 0x109   :  { %v460_v24 = vpop.f32.mrf.mxu0 }
 0x10a   :  { %v461_v20 = vadd.f32 %v2466_v48, %v460_v24  ;;  %1395 = vrot.lane.b32.xlu0 %v469_v14, %s2188_s4  ;;  %2055 = vmatmul.mubr.msk.f32.gmra.mxu1 %vm72_vm1, %v664_v23  ;;  %v669_v56 = vmul.f32 %v642_v51, %v469_v14 }
 0x10b   :  { %v2024_v27 = vpop.f32.mrf.mxu0  ;;  %2057 = vmatprep.mubr.msk.f32.mxu1 %vm72_vm1, %v665_v19 }
 0x10c   :  { %v667_v45 = vmul.f32 %v638_v25, %v461_v20  ;;  %1385 = vrot.lane.b32.xlu1 %v448_v12, %s2188_s4  ;;  %v472_v47 = vadd.f32 %v2024_v27, %v2466_v48 }
 0x10d   :  { %v463_v46 = vpop.f32.mrf.mxu0 }
 0x10e   :  { %v464_v49 = vadd.f32 %v2466_v48, %v463_v46  ;;  %1391 = vrot.lane.b32.xlu0 %v461_v20, %s2188_s4  ;;  %2058 = vmatmul.mubr.msk.f32.gmra.mxu1 %vm72_vm1, %v666_v28  ;;  %v670_v62 = vmul.f32 %v642_v51, %v472_v47 }
 0x10f   :  { %v2027_v53 = vpop.f32.mrf.mxu0  ;;  %2060 = vmatprep.mubr.msk.f32.mxu1 %vm72_vm1, %v667_v45 }
 0x110   :  { %v668_v55 = vmul.f32 %v638_v25, %v464_v49  ;;  %1397 = vrot.lane.b32.xlu1 %v472_v47, %s2188_s4  ;;  %v485_v0 = vadd.f32 %v2027_v53, %v2466_v48 }
 0x111   :  { %v476_v57 = vpop.f32.mrf.mxu0 }
 0x112   :  { %v477_v58 = vadd.f32 %v2466_v48, %v476_v57  ;;  %2061 = vmatmul.mubr.msk.f32.gmra.mxu1 %vm72_vm1, %v668_v55  ;;  %v673_v34 = vmul.f32 %v650_v31, %v485_v0 }
 0x113   :  { %v2028_v61 = vpop.f32.mrf.mxu0  ;;  %2063 = vmatprep.mubr.msk.f32.mxu1 %vm72_vm1, %v669_v56 }
 0x114   :  { %v671_v63 = vmul.f32 %v646_v59, %v477_v58  ;;  %1393 = vrot.lane.b32.xlu1 %v464_v49, %s2188_s4  ;;  %1399 = vrot.lane.b32.xlu0 %v477_v58, %s2188_s4  ;;  %v488_v32 = vadd.f32 %v2028_v61, %v2466_v48 }
 0x115   :  { %v479_v29 = vpop.f32.mrf.mxu0 }
 0x116   :  { %v480_v30 = vadd.f32 %v2466_v48, %v479_v29  ;;  %2064 = vmatmul.mubr.msk.f32.gmra.mxu1 %vm72_vm1, %v670_v62  ;;  %v674_v35 = vmul.f32 %v650_v31, %v488_v32  ;;  %v2547_v48 = vld [vmem:[%s2772_s10] sm:$0xf] }
 0x117   :  { %2066 = vmatprep.mubr.msk.f32.mxu1 %vm72_vm1, %v671_v63  ;;  %2072 = vmatprep.subr.msk.mxu0 %vm1210_vm9, %v2547_v48 }
 0x118   :  { %v672_v33 = vmul.f32 %v646_v59, %v480_v30  ;;  %1401 = vrot.lane.b32.xlu1 %v480_v30, %s2188_s4  ;;  %1403 = vrot.lane.b32.xlu0 %v485_v0, %s2188_s4 }
 0x119   :  { %2099 = vmatpush3.msk.msra.mxu1 %vm1210_vm9, %v2547_v48  ;;  %2073 = vmatpush3.msk.msra.mxu0 %vm1210_vm9, %v2547_v48 }
 0x11a   :  { %2067 = vmatmul.mubr.msk.f32.gmra.mxu1 %vm72_vm1, %v672_v33  ;;  %2103 = vmatprep.subr.mxu1 %v2185_v1 }
 0x11b   :  { %2069 = vmatprep.mubr.msk.f32.mxu1 %vm72_vm1, %v673_v34 }
 0x11c   :  { %1405 = vrot.lane.b32.xlu1 %v488_v32, %s2188_s4  ;;  %1585 = vrot.lane.b32.xlu0 %v2471_v54, %s2188_s4 }
 0x11e   :  { %2070 = vmatmul.mubr.msk.f32.gmra.mxu1 %vm72_vm1, %v674_v35 }
 0x11f   :  { %2100 = vmatprep.mubr.msk.f32.mxu1 %vm2186_vm0, %v2185_v1 }
 0x1b6   :  { %v2556_v54 = vpop.f32.mrf.mxu1 }
 0x1b7   :  { %v942_v49 = vrot.slane %v2556_v54, 1  ;;  %v943_v29 = vrot.slane %v2556_v54, 2 }
 0x1b8   :  { %v2039_v36 = vpop.f32.mrf.mxu1 }
 0x1c2   :  { %v2050_v52 = vpop.f32.mrf.mxu1 }
 0x1c3   :  { %v870_v38 = vsel %vm868_vm10, %v2050_v52, -inf }
 0x1c4   :  { %v789_v37 = vpop.f32.mrf.mxu1 }
 0x1c5   :  { %v869_v39 = vsel %vm868_vm10, %v789_v37, -inf }
 0x1c6   :  { %v871_v40 = vmax.f32 %v869_v39, %v870_v38  ;;  %v2560_v41 = vpop.f32.mrf.mxu1 }
 0x1c7   :  { %v879_v8 = vsel %vm868_vm10, %v2560_v41, -inf }
 0x1c8   :  { %v872_v42 = vrot.slane %v871_v40, 4  ;;  %v2562_v43 = vpop.f32.mrf.mxu1 }
 0x1c9   :  { %v878_v5 = vsel %vm868_vm10, %v2562_v43, -inf }
 0x1ca   :  { %v873_v9 = vmax.f32 %v871_v40, %v872_v42  ;;  %v880_v44 = vmax.f32 %v878_v5, %v879_v8  ;;  %v2568_v6 = vpop.f32.mrf.mxu1 }
 0x1cb   :  { %v888_v11 = vsel %vm868_vm10, %v2568_v6, -inf }
 0x1cc   :  { %v874_v2 = vrot.slane %v873_v9, 2  ;;  %v881_v10 = vrot.slane %v880_v44, 4  ;;  %v2570_v7 = vpop.f32.mrf.mxu1 }
 0x1cd   :  { %v887_v15 = vsel %vm868_vm10, %v2570_v7, -inf }
 0x1ce   :  { %v875_v16 = vmax.f32 %v873_v9, %v874_v2  ;;  %v882_v4 = vmax.f32 %v880_v44, %v881_v10  ;;  %v889_v17 = vmax.f32 %v887_v15, %v888_v11  ;;  %v2576_v12 = vpop.f32.mrf.mxu1 }
 0x1cf   :  { %v897_v23 = vsel %vm868_vm10, %v2576_v12, -inf }
 0x1d0   :  { %v876_v18 = vrot.slane %v875_v16, 1  ;;  %v883_v13 = vrot.slane %v882_v4, 2  ;;  %v890_v21 = vrot.slane %v889_v17, 4  ;;  %v2578_v22 = vpop.f32.mrf.mxu1 }
 0x1d1   :  { %v896_v14 = vsel %vm868_vm10, %v2578_v22, -inf }
 0x1d2   :  { %v877_v19 = vmax.f32 %v875_v16, %v876_v18  ;;  %v884_v24 = vmax.f32 %v882_v4, %v883_v13  ;;  %v891_v20 = vmax.f32 %v889_v17, %v890_v21  ;;  %v898_v25 = vmax.f32 %v896_v14, %v897_v23  ;;  %v2584_v26 = vpop.f32.mrf.mxu1 }
 0x1d3   :  { %v906_v50 = vsel %vm868_vm10, %v2584_v26, -inf }
 0x1d4   :  { %v2587_v27 = vmax.f32 %v877_v19, %v2556_v54  ;;  %v885_v28 = vrot.slane %v884_v24, 1  ;;  %v892_v45 = vrot.slane %v891_v20, 2  ;;  %v899_v46 = vrot.slane %v898_v25, 4  ;;  %v2589_v47 = vpop.f32.mrf.mxu1 }
 0x1d5   :  { %v905_v51 = vsel %vm868_vm10, %v2589_v47, -inf }
 0x1d6   :  { %v994_v53 = vrot.slane %v2587_v27, %v2475_v3  ;;  %v886_v55 = vmax.f32 %v884_v24, %v885_v28  ;;  %v893_v56 = vmax.f32 %v891_v20, %v892_v45  ;;  %v900_v57 = vmax.f32 %v898_v25, %v899_v46  ;;  %v2598_v58 = vpop.f32.mrf.mxu1 }
 0x1d7   :  { %v907_v59 = vmax.f32 %v905_v51, %v906_v50  ;;  %v915_v36 = vsel %vm868_vm10, %v2598_v58, -inf }
 0x1d8   :  { %v1023_v60 = vsub.f32 %v789_v37, %v994_v53  ;;  %v1024_v61 = vsub.f32 %v2050_v52, %v994_v53  ;;  %v2600_v62 = vmax.f32 %v886_v55, %v942_v49  ;;  %v894_v63 = vrot.slane %v893_v56, 1  ;;  %v2602_v0 = vpop.f32.mrf.mxu1 }
 0x1d9   :  { %v901_v30 = vrot.slane %v900_v57, 2  ;;  %v908_v31 = vrot.slane %v907_v59, 4  ;;  %v914_v32 = vsel %vm868_vm10, %v2602_v0, -inf  ;;  %v945_v53 = vrot.slane %v2556_v54, 4 }
 0x1da   :  { %v1039_v33 = vmul.f32 1.442695, %v1023_v60  ;;  %v1041_v34 = vmul.f32 1.442695, %v1024_v61  ;;  %v998_v35 = vrot.slane %v2600_v62, %v2475_v3  ;;  %v2611_v52 = vpop.f32.mrf.mxu1  ;;  %v895_v37 = vmax.f32 %v893_v56, %v894_v63 }
 0x1db   :  { %v902_v38 = vmax.f32 %v900_v57, %v901_v30  ;;  %v909_v39 = vmax.f32 %v907_v59, %v908_v31  ;;  %v916_v40 = vmax.f32 %v914_v32, %v915_v36  ;;  %v924_v19 = vsel %vm868_vm10, %v2611_v52, -inf }
 0x1dc   :  { %2127 = vpow2.f32 %v1039_v33  ;;  %v1025_v42 = vsub.f32 %v2562_v43, %v998_v35  ;;  %v1026_v8 = vsub.f32 %v2560_v41, %v998_v35  ;;  %v2615_v5 = vpop.f32.mrf.mxu1  ;;  %v2617_v9 = vmax.f32 %v895_v37, %v943_v29 }
 0x1dd   :  { %2129 = vpow2.f32 %v1041_v34  ;;  %v903_v44 = vrot.slane %v902_v38, 1  ;;  %v910_v2 = vrot.slane %v909_v39, 2  ;;  %v917_v15 = vrot.slane %v916_v40, 4 }
 0x1de   :  { %v1043_v10 = vmul.f32 1.442695, %v1025_v42  ;;  %v1045_v11 = vmul.f32 1.442695, %v1026_v8  ;;  %v2619_v16 = vpop.f32.mrf.mxu1  ;;  %v1002_v4 = vrot.slane %v2617_v9, %v2475_v3  ;;  %v944_v41 = vrot.slane %v2556_v54, 3 }
 0x1df   :  { %v904_v17 = vmax.f32 %v902_v38, %v903_v44  ;;  %v911_v18 = vmax.f32 %v909_v39, %v910_v2  ;;  %v918_v43 = vmax.f32 %v916_v40, %v917_v15  ;;  %v923_v13 = vsel %vm868_vm10, %v2615_v5, -inf }
 0x1e0   :  { %2131 = vpow2.f32 %v1043_v10  ;;  %v2626_v21 = vpop.f32.mrf.mxu1  ;;  %v1027_v23 = vsub.f32 %v2570_v7, %v1002_v4  ;;  %v1028_v14 = vsub.f32 %v2568_v6, %v1002_v4  ;;  %v925_v28 = vmax.f32 %v923_v13, %v924_v19 }
 0x1e1   :  { %2133 = vpow2.f32 %v1045_v11  ;;  %v2632_v24 = vmax.f32 %v904_v17, %v944_v41  ;;  %v912_v20 = vrot.slane %v911_v18, 1  ;;  %v919_v25 = vrot.slane %v918_v43, 2 }
 0x1e2   :  { %v1047_v45 = vmul.f32 1.442695, %v1027_v23  ;;  %v1049_v46 = vmul.f32 1.442695, %v1028_v14  ;;  %v932_v49 = vsel %vm868_vm10, %v2626_v21, -inf  ;;  %v933_v6 = vsel %vm868_vm10, %v2619_v16, -inf }
 0x1e3   :  { %v1006_v50 = vrot.slane %v2632_v24, %v2475_v3  ;;  %v913_v51 = vmax.f32 %v911_v18, %v912_v20  ;;  %v920_v7 = vmax.f32 %v918_v43, %v919_v25  ;;  %v926_v55 = vrot.slane %v925_v28, 4 }
 0x1e4   :  { %2135 = vpow2.f32 %v1047_v45  ;;  %v934_v56 = vmax.f32 %v932_v49, %v933_v6  ;;  %v946_v37 = vrot.slane %v2556_v54, 5  ;;  %v973_v43 = vrot.slane %v2600_v62, 7 }
 0x1e5   :  { %2137 = vpow2.f32 %v1049_v46  ;;  %v1029_v57 = vsub.f32 %v2578_v22, %v1006_v50  ;;  %v1030_v59 = vsub.f32 %v2576_v12, %v1006_v50  ;;  %v2643_v60 = vmax.f32 %v913_v51, %v945_v53 }
 0x1e6   :  { %v921_v61 = vrot.slane %v920_v7, 1  ;;  %v927_v63 = vmax.f32 %v925_v28, %v926_v55  ;;  %v935_v29 = vrot.slane %v934_v56, 4  ;;  %v975_v23 = vrot.slane %v2617_v9, 6 }
 0x1e7   :  { %v1051_v30 = vmul.f32 1.442695, %v1029_v57  ;;  %v1053_v31 = vmul.f32 1.442695, %v1030_v59  ;;  %v1010_v33 = vrot.slane %v2643_v60, %v2475_v3  ;;  %v977_v25 = vrot.slane %v2632_v24, 5 }
 0x1e8   :  { %v922_v34 = vmax.f32 %v920_v7, %v921_v61  ;;  %v928_v35 = vrot.slane %v927_v63, 2  ;;  %v936_v22 = vmax.f32 %v934_v56, %v935_v29  ;;  %v948_v62 = vrot.slane %v2556_v54, 7 }
 0x1e9   :  { %v2128_v32 = vpop.eup %2127  ;;  %2139 = vpow2.f32 %v1051_v30  ;;  %v1031_v12 = vsub.f32 %v2589_v47, %v1010_v33  ;;  %v1032_v38 = vsub.f32 %v2584_v26, %v1010_v33  ;;  %v947_v47 = vrot.slane %v2556_v54, 6 }
 0x1ea   :  { %v2130_v36 = vpop.eup %2129  ;;  %2074 = vmatprep.mubr.msk.f32.mxu0 %vm868_vm10, %v2128_v32  ;;  %2141 = vpow2.f32 %v1053_v31  ;;  %v962_v39 = vmax.f32 %v922_v34, %v946_v37  ;;  %v929_v40 = vmax.f32 %v927_v63, %v928_v35  ;;  %v937_v44 = vrot.slane %v936_v22, 2 }
 0x1eb   :  { %2075 = vmatmul.mubr.msk.f32.vlgmr.msra.gmra.mxu0 %vm868_vm10, %v2130_v36  ;;  %v1055_v8 = vmul.f32 1.442695, %v1031_v12  ;;  %v1057_v10 = vmul.f32 1.442695, %v1032_v38  ;;  %v974_v9 = vsel %vm230_vm2, %v973_v43, %v2587_v27  ;;  %v1071_v56 = vsel %vm868_vm10, %v2128_v32, 0.0 }
 0x1ec   :  { %v1014_v11 = vrot.slane %v962_v39, %v2475_v3  ;;  %v930_v15 = vrot.slane %v929_v40, 1  ;;  %v938_v18 = vmax.f32 %v936_v22, %v937_v44  ;;  %v981_v45 = vrot.slane %v962_v39, 3 }
 0x1ed   :  { %v2132_v42 = vpop.eup %2131  ;;  %2143 = vpow2.f32 %v1055_v8  ;;  %v976_v50 = vsel %vm233_vm3, %v975_v23, %v974_v9 }
 0x1ee   :  { %v2134_v2 = vpop.eup %2133  ;;  %2077 = vmatprep.mubr.msk.f32.mxu0 %vm868_vm10, %v2132_v42  ;;  %2145 = vpow2.f32 %v1057_v10  ;;  %v1033_v26 = vsub.f32 %v2602_v0, %v1014_v11  ;;  %v1034_v4 = vsub.f32 %v2598_v58, %v1014_v11  ;;  %v931_v17 = vmax.f32 %v929_v40, %v930_v15 }
 0x1ef   :  { %2078 = vmatmul.mubr.msk.f32.gmra.mxu0 %vm868_vm10, %v2134_v2  ;;  %v939_v28 = vrot.slane %v938_v18, 1  ;;  %v979_v58 = vrot.slane %v2643_v60, 4  ;;  %v978_v53 = vsel %vm236_vm4, %v977_v25, %v976_v50  ;;  %v1072_v60 = vsel %vm868_vm10, %v2130_v36, 0.0 }
 0x1f0   :  { %v1059_v14 = vmul.f32 1.442695, %v1033_v26  ;;  %v1061_v19 = vmul.f32 1.442695, %v1034_v4  ;;  %v963_v20 = vmax.f32 %v931_v17, %v947_v47  ;;  %v1080_v63 = vsel %vm868_vm10, %v2132_v42, 0.0 }
 0x1f1   :  { %v2136_v41 = vpop.eup %2135  ;;  %v940_v46 = vmax.f32 %v938_v18, %v939_v28  ;;  %v980_v27 = vsel %vm239_vm5, %v979_v58, %v978_v53  ;;  %v1081_v29 = vsel %vm868_vm10, %v2134_v2, 0.0  ;;  %v1073_v2 = vadd.f32 %v1072_v60, %v1071_v56 }
 0x1f2   :  { %v2138_v13 = vpop.eup %2137  ;;  %2080 = vmatprep.mubr.msk.f32.mxu0 %vm868_vm10, %v2136_v41  ;;  %2147 = vpow2.f32 %v1059_v14  ;;  %v1018_v0 = vrot.slane %v963_v20, %v2475_v3  ;;  %v983_v24 = vrot.slane %v963_v20, 2  ;;  %v1089_v32 = vsel %vm868_vm10, %v2136_v41, 0.0 }
 0x1f3   :  { %2081 = vmatmul.mubr.msk.f32.gmra.mxu0 %vm868_vm10, %v2138_v13  ;;  %2149 = vpow2.f32 %v1061_v19  ;;  %v964_v55 = vmax.f32 %v940_v46, %v948_v62  ;;  %v1090_v33 = vsel %vm868_vm10, %v2138_v13, 0.0  ;;  %v1082_v12 = vadd.f32 %v1081_v29, %v1080_v63 }
 0x1f4   :  { %v1035_v51 = vsub.f32 %v2615_v5, %v1018_v0  ;;  %v1036_v7 = vsub.f32 %v2611_v52, %v1018_v0  ;;  %v982_v5 = vsel %vm242_vm6, %v981_v45, %v980_v27  ;;  %v1091_v42 = vadd.f32 %v1090_v33, %v1089_v32 }
 0x1f5   :  { %v985_v61 = vrot.slane %v964_v55, 1  ;;  %v1022_v52 = vrot.slane %v964_v55, %v2475_v3  ;;  %v984_v30 = vsel %vm245_vm7, %v983_v24, %v982_v5  ;;  %v1083_v15 = vrot.slane %v1082_v12, 4 }
 0x1f6   :  { %v2140_v49 = vpop.eup %2139  ;;  %v1063_v57 = vmul.f32 1.442695, %v1035_v51  ;;  %v1065_v59 = vmul.f32 1.442695, %v1036_v7  ;;  %v1092_v26 = vrot.slane %v1091_v42, 4 }
 0x1f7   :  { %v2142_v6 = vpop.eup %2141  ;;  %2083 = vmatprep.mubr.msk.f32.mxu0 %vm868_vm10, %v2140_v49  ;;  %v986_v34 = vsel %vm248_vm8, %v985_v61, %v984_v30  ;;  %v1098_v36 = vsel %vm868_vm10, %v2140_v49, 0.0  ;;  %v1037_v22 = vsub.f32 %v2626_v21, %v1022_v52  ;;  %v1038_v40 = vsub.f32 %v2619_v16, %v1022_v52 }
 0x1f8   :  { %2084 = vmatmul.mubr.msk.f32.gmra.mxu0 %vm868_vm10, %v2142_v6  ;;  %2151 = vpow2.f32 %v1063_v57  ;;  %v1099_v3 = vsel %vm868_vm10, %v2142_v6, 0.0  ;;  %v988_v37 = vsub.f32 %v2556_v54, %v986_v34  ;;  %v1074_v16 = vrot.slane %v1073_v2, 4 }
 0x1f9   :  { %2153 = vpow2.f32 %v1065_v59  ;;  %v1067_v44 = vmul.f32 1.442695, %v1037_v22  ;;  %v1100_v10 = vadd.f32 %v1099_v3, %v1098_v36  ;;  %v1069_v11 = vmul.f32 1.442695, %v1038_v40 }
 0x1fa   :  { %v2144_v31 = vpop.eup %2143  ;;  %v989_v8 = vmul.f32 1.442695, %v988_v37  ;;  %v1084_v13 = vadd.f32 %v1083_v15, %v1082_v12  ;;  %v1093_v23 = vadd.f32 %v1092_v26, %v1091_v42  ;;  %v1075_v20 = vadd.f32 %v1074_v16, %v1073_v2 }
 0x1fb   :  { %v2146_v35 = vpop.eup %2145  ;;  %2086 = vmatprep.mubr.msk.f32.mxu0 %vm868_vm10, %v2144_v31  ;;  %v1107_v38 = vsel %vm868_vm10, %v2144_v31, 0.0  ;;  %v1101_v17 = vrot.slane %v1100_v10, 4 }
 0x1fc   :  { %v1108_v39 = vsel %vm868_vm10, %v2146_v35, 0.0  ;;  %2087 = vmatmul.mubr.msk.f32.gmra.mxu0 %vm868_vm10, %v2146_v35  ;;  %2155 = vpow2.f32 %v989_v8  ;;  %v1085_v62 = vrot.slane %v1084_v13, 2  ;;  %v1094_v46 = vrot.slane %v1093_v23, 2 }
 0x1fd   :  { %v1109_v54 = vadd.f32 %v1108_v39, %v1107_v38  ;;  %2157 = vpow2.f32 %v1067_v44  ;;  %v1102_v25 = vadd.f32 %v1101_v17, %v1100_v10  ;;  %v1076_v50 = vrot.slane %v1075_v20, 2 }
 0x1fe   :  { %2159 = vpow2.f32 %v1069_v11  ;;  %v1086_v53 = vadd.f32 %v1085_v62, %v1084_v13  ;;  %v1095_v27 = vadd.f32 %v1094_v46, %v1093_v23  ;;  %v2125_v13 = vld [vmem:[%s2769_s7 + $0x8] sm:$0xff]   ;;  %v2126_v23 = vld [vmem:[%s2769_s7] sm:$0xff]  }
 0x1ff   :  { %v2148_v21 = vpop.eup %2147  ;;  %v1110_v41 = vrot.slane %v1109_v54, 4  ;;  %v1103_v24 = vrot.slane %v1102_v25, 2  ;;  %v1077_v60 = vadd.f32 %v1076_v50, %v1075_v20 }
 0x200   :  { %v2150_v47 = vpop.eup %2149  ;;  %v1116_v4 = vsel %vm868_vm10, %v2148_v21, 0.0  ;;  %2089 = vmatprep.mubr.msk.f32.mxu0 %vm868_vm10, %v2148_v21  ;;  %v1087_v30 = vrot.slane %v1086_v53, 1  ;;  %v1096_v33 = vrot.slane %v1095_v27, 1 }
 0x201   :  { %v1117_v18 = vsel %vm868_vm10, %v2150_v47, 0.0  ;;  %2090 = vmatmul.mubr.msk.f32.gmra.mxu0 %vm868_vm10, %v2150_v47  ;;  %v1111_v58 = vadd.f32 %v1110_v41, %v1109_v54  ;;  %v1104_v5 = vadd.f32 %v1103_v24, %v1102_v25  ;;  %v1078_v35 = vrot.slane %v1077_v60, 1 }
 0x202   :  { %v1118_v43 = vadd.f32 %v1117_v18, %v1116_v4  ;;  %v1088_v37 = vadd.f32 %v1087_v30, %v1086_v53  ;;  %v1097_v38 = vadd.f32 %v1096_v33, %v1095_v27 }
 0x203   :  { %v1112_v51 = vrot.slane %v1111_v58, 2  ;;  %v1105_v36 = vrot.slane %v1104_v5, 1  ;;  %v1079_v40 = vadd.f32 %v1078_v35, %v1077_v60 }
 0x204   :  { %v1119_v14 = vrot.slane %v1118_v43, 4 }
 0x205   :  { %v2152_v19 = vpop.eup %2151  ;;  %v1113_v52 = vadd.f32 %v1112_v51, %v1111_v58  ;;  %v1106_v42 = vadd.f32 %v1105_v36, %v1104_v5  ;;  %v1151_v2 = vsel %vm230_vm2, %v1088_v37, %v1079_v40 }
 0x206   :  { %v2154_v28 = vpop.eup %2153  ;;  %v1125_v0 = vsel %vm868_vm10, %v2152_v19, 0.0  ;;  %2092 = vmatprep.mubr.msk.f32.mxu0 %vm868_vm10, %v2152_v19  ;;  %v1120_v9 = vadd.f32 %v1119_v14, %v1118_v43  ;;  %v1152_v54 = vsel %vm233_vm3, %v1097_v38, %v1151_v2  ;;  %v1378_v14 = vpop.permute.xlu1 %1377 }
 0x207   :  { %v1126_v45 = vsel %vm868_vm10, %v2154_v28, 0.0  ;;  %2093 = vmatmul.mubr.msk.f32.gmra.mxu0 %vm868_vm10, %v2154_v28  ;;  %v1153_v15 = vsel %vm236_vm4, %v1106_v42, %v1152_v54  ;;  %v1380_v19 = vpop.permute.xlu0 %1379 }
 0x208   :  { %v1127_v49 = vadd.f32 %v1126_v45, %v1125_v0  ;;  %v1121_v55 = vrot.slane %v1120_v9, 2 }
 0x209   :  { %v2156_v6 = vpop.eup %2155 }
 0x20a   :  { %v1128_v7 = vrot.slane %v1127_v49, 4  ;;  %v2158_v56 = vpop.eup %2157  ;;  %2101 = vmatmul.mubr.msk.f32.vlgmr.msra.gmra.mxu1 %vm868_vm10, %v2156_v6  ;;  %v1122_v31 = vadd.f32 %v1121_v55, %v1120_v9  ;;  %v1384_v25 = vpop.permute.xlu1 %1383 }
 0x20b   :  { %v2160_v59 = vpop.eup %2159  ;;  %v1134_v61 = vsel %vm868_vm10, %v2158_v56, 0.0  ;;  %2095 = vmatprep.mubr.msk.f32.mxu0 %vm868_vm10, %v2158_v56  ;;  %2104 = vmatpush3.msk.msra.mxu1 %vm1210_vm9, %v2547_v48  ;;  %v1114_v48 = vrot.slane %v1113_v52, 1  ;;  %v1376_v0 = vpop.permute.xlu0 %1375 }
 0x20c   :  { %v1129_v57 = vadd.f32 %v1128_v7, %v1127_v49  ;;  %v1135_v29 = vsel %vm868_vm10, %v2160_v59, 0.0  ;;  %2096 = vmatmul.mubr.msk.f32.gmra.mxu0 %vm868_vm10, %v2160_v59  ;;  %2105 = vmatprep.mubr.msk.f32.mxu1 %vm2186_vm0, %v2185_v1  ;;  %v1123_v22 = vrot.slane %v1122_v31, 1 }
 0x20d   :  { %v1136_v32 = vadd.f32 %v1135_v29, %v1134_v61  ;;  %2108 = vmatprep.subr.bf16.mxu1 %v2185_v1  ;;  %v1115_v44 = vadd.f32 %v1114_v48, %v1113_v52 }
 0x20e   :  { %v1130_v63 = vrot.slane %v1129_v57, 2  ;;  %v1124_v10 = vadd.f32 %v1123_v22, %v1122_v31  ;;  %v1390_v9 = vpop.permute.xlu1 %1389 }
 0x20f   :  { %v1137_v3 = vrot.slane %v1136_v32, 4  ;;  %v1154_v26 = vsel %vm239_vm5, %v1115_v44, %v1153_v15  ;;  %v1382_v49 = vpop.permute.xlu0 %1381 }
 0x210   :  { %v1131_v34 = vadd.f32 %v1130_v63, %v1129_v57  ;;  %v1155_v4 = vsel %vm242_vm6, %v1124_v10, %v1154_v26 }
 0x211   :  { %v1138_v12 = vadd.f32 %v1137_v3, %v1136_v32 }
 0x212   :  { %v1132_v39 = vrot.slane %v1131_v34, 1  ;;  %v1386_v50 = vpop.permute.xlu1 %1385 }
 0x213   :  { %v1139_v8 = vrot.slane %v1138_v12, 2  ;;  %v1388_v7 = vpop.permute.xlu0 %1387 }
 0x214   :  { %v1133_v21 = vadd.f32 %v1132_v39, %v1131_v34 }
 0x215   :  { %v1140_v11 = vadd.f32 %v1139_v8, %v1138_v12 }
 0x216   :  { %v1156_v17 = vsel %vm245_vm7, %v1133_v21, %v1155_v4 }
 0x217   :  { %v1141_v47 = vrot.slane %v1140_v11, 1  ;;  %v1396_v55 = vpop.permute.xlu0 %1395 }
 0x219   :  { %v1142_v16 = vadd.f32 %v1141_v47, %v1140_v11 }
 0x21b   :  { %v1157_v18 = vsel %vm248_vm8, %v1142_v16, %v1156_v17  ;;  %v1392_v59 = vpop.permute.xlu0 %1391 }
 0x21c   :  { %v1159_v41 = vadd.f32 %v2156_v6, %v1157_v18  ;;  %v1398_v6 = vpop.permute.xlu1 %1397 }
 0x21e   :  { %2161 = vrcp.f32 %v1159_v41 }
 0x21f   :  { %v1400_v30 = vpop.permute.xlu0 %1399 }
 0x220   :  { %v1394_v56 = vpop.permute.xlu1 %1393 }
 0x223   :  { %v1404_v26 = vpop.permute.xlu0 %1403 }
 0x224   :  { %v1402_v60 = vpop.permute.xlu1 %1401 }
 0x228   :  { %v1406_v12 = vpop.permute.xlu1 %1405 }
 0x22b   :  { %v2162_v43 = vpop.eup %2161 }
 0x22c   :  { %2106 = vmatmul.mubr.msk.f32.vlgmr.msra.gmra.mxu1 %vm868_vm10, %v2162_v43 }
 0x22d   :  { %2112 = vmatprep.mubr.msk.bf16.mxu1 %vm2186_vm0, %v2185_v1  ;;  %2109 = vmatpush3.bf16.msra.mxu1 %v2125_v13 }
 0x22e   :  { %2110 = vmatprep.subr.bf16.mxu1 %v2185_v1 }
 0x231   :  { %2111 = vmatpush3.bf16.msra.mxu1 %v2126_v23 }
 0x2ab   :  { %v2076_v20 = vpop.f32.mrf.mxu0 }
 0x2ac   :  { %v1424_v52 = vmul.f32 %v2076_v20, %v1378_v14 }
 0x2ad   :  { %v1280_v28 = vpop.f32.mrf.mxu0 }
 0x2ae   :  { %v1423_v5 = vmul.f32 %v1376_v0, %v1280_v28  ;;  %v1440_v36 = vsel %vm72_vm1, %v1424_v52, 0.0 }
 0x2af   :  { %v2079_v58 = vpop.f32.mrf.mxu0 }
 0x2b0   :  { %v1439_v32 = vsel %vm72_vm1, %v1423_v5, 0.0  ;;  %v1426_v3 = vmul.f32 %v2079_v58, %v1382_v49 }
 0x2b1   :  { %v1290_v62 = vpop.f32.mrf.mxu0  ;;  %v1441_v8 = vadd.f32 %v1440_v36, %v1439_v32 }
 0x2b2   :  { %v1425_v48 = vmul.f32 %v1380_v19, %v1290_v62  ;;  %v1449_v4 = vsel %vm72_vm1, %v1426_v3, 0.0 }
 0x2b3   :  { %v2082_v45 = vpop.f32.mrf.mxu0 }
 0x2b4   :  { %v1428_v44 = vmul.f32 %v2082_v45, %v1386_v50  ;;  %v1448_v16 = vsel %vm72_vm1, %v1425_v48, 0.0 }
 0x2b5   :  { %v1300_v46 = vpop.f32.mrf.mxu0  ;;  %v1450_v58 = vadd.f32 %v1449_v4, %v1448_v16 }
 0x2b6   :  { %v1427_v37 = vmul.f32 %v1384_v25, %v1300_v46  ;;  %v1458_v19 = vsel %vm72_vm1, %v1428_v44, 0.0 }
 0x2b8   :  { %v2085_v24 = vpop.f32.mrf.mxu0  ;;  %v1457_v17 = vsel %vm72_vm1, %v1427_v37, 0.0 }
 0x2b9   :  { %v1430_v31 = vmul.f32 %v2085_v24, %v1390_v9  ;;  %v1459_v0 = vadd.f32 %v1458_v19, %v1457_v17 }
 0x2ba   :  { %v1310_v51 = vpop.f32.mrf.mxu0 }
 0x2bb   :  { %v1429_v63 = vmul.f32 %v1388_v7, %v1310_v51  ;;  %v1467_v2 = vsel %vm72_vm1, %v1430_v31, 0.0  ;;  %v1442_v7 = vrot.slane %v1441_v8, 4 }
 0x2bc   :  { %v2088_v53 = vpop.f32.mrf.mxu0 }
 0x2bd   :  { %v1466_v38 = vsel %vm72_vm1, %v1429_v63, 0.0  ;;  %v1432_v39 = vmul.f32 %v2088_v53, %v1394_v56  ;;  %v1460_v53 = vrot.slane %v1459_v0, 4 }
 0x2be   :  { %v1320_v1 = vpop.f32.mrf.mxu0  ;;  %v1468_v18 = vadd.f32 %v1467_v2, %v1466_v38 }
 0x2bf   :  { %v1431_v33 = vmul.f32 %v1392_v59, %v1320_v1  ;;  %v1476_v43 = vsel %vm72_vm1, %v1432_v39, 0.0  ;;  %v1443_v59 = vadd.f32 %v1442_v7, %v1441_v8  ;;  %v1461_v5 = vadd.f32 %v1460_v53, %v1459_v0  ;;  %v1586_v39 = vpop.permute.xlu0 %1585 }
 0x2c0   :  { %v1469_v46 = vrot.slane %v1468_v18, 4 }
 0x2c1   :  { %v2091_v27 = vpop.f32.mrf.mxu0  ;;  %v1475_v54 = vsel %vm72_vm1, %v1431_v33, 0.0  ;;  %v1444_v31 = vrot.slane %v1443_v59, 2  ;;  %v1462_v33 = vrot.slane %v1461_v5, 2 }
 0x2c2   :  { %v1434_v40 = vmul.f32 %v2091_v27, %v1398_v6  ;;  %v1477_v20 = vadd.f32 %v1476_v43, %v1475_v54  ;;  %v1451_v6 = vrot.slane %v1450_v58, 4  ;;  %v1470_v1 = vadd.f32 %v1469_v46, %v1468_v18 }
 0x2c3   :  { %v1330_v57 = vpop.f32.mrf.mxu0  ;;  %v1445_v37 = vadd.f32 %v1444_v31, %v1443_v59  ;;  %v1463_v38 = vadd.f32 %v1462_v33, %v1461_v5 }
 0x2c4   :  { %v1433_v34 = vmul.f32 %v1396_v55, %v1330_v57  ;;  %v1485_v13 = vsel %vm72_vm1, %v1434_v40, 0.0  ;;  %v1478_v49 = vrot.slane %v1477_v20, 4 }
 0x2c6   :  { %v1484_v21 = vsel %vm72_vm1, %v1433_v34, 0.0  ;;  %v1479_v55 = vadd.f32 %v1478_v49, %v1477_v20 }
 0x2c7   :  { %v2094_v61 = vpop.f32.mrf.mxu0  ;;  %v1486_v25 = vadd.f32 %v1485_v13, %v1484_v21  ;;  %v1464_v21 = vrot.slane %v1463_v38, 1 }
 0x2c8   :  { %v1436_v42 = vmul.f32 %v2094_v61, %v1402_v60  ;;  %v1452_v60 = vadd.f32 %v1451_v6, %v1450_v58  ;;  %v1471_v61 = vrot.slane %v1470_v1, 2  ;;  %v1480_v52 = vrot.slane %v1479_v55, 2 }
 0x2c9   :  { %v1340_v29 = vpop.f32.mrf.mxu0  ;;  %v1487_v50 = vrot.slane %v1486_v25, 4 }
 0x2ca   :  { %v1435_v35 = vmul.f32 %v1400_v30, %v1340_v29  ;;  %v2731_v22 = vpop.f32.mrf.mxu1  ;;  %v1494_v23 = vsel %vm72_vm1, %v1436_v42, 0.0  ;;  %v1453_v32 = vrot.slane %v1452_v60, 2  ;;  %v1472_v34 = vadd.f32 %v1471_v61, %v1470_v1 }
 0x2cb   :  { %v1488_v56 = vadd.f32 %v1487_v50, %v1486_v25  ;;  %v1588_v42 = vmul.f32 %v1586_v39, %v2731_v22 }
 0x2cc   :  { %v2097_v10 = vpop.f32.mrf.mxu0  ;;  %v2102_v11 = vpop.f32.mrf.mxu1  ;;  %v1493_v15 = vsel %vm72_vm1, %v1435_v35, 0.0  ;;  %v1481_v35 = vadd.f32 %v1480_v52, %v1479_v55  ;;  %v1473_v40 = vrot.slane %v1472_v34, 1 }
 0x2cd   :  { %v1438_v47 = vmul.f32 %v2097_v10, %v1406_v12  ;;  %v1495_v28 = vadd.f32 %v1494_v23, %v1493_v15  ;;  %v1489_v63 = vrot.slane %v1488_v56, 2  ;;  %v1454_v12 = vadd.f32 %v1453_v32, %v1452_v60 }
 0x2ce   :  { %v1350_v41 = vpop.f32.mrf.mxu0  ;;  %v1482_v8 = vrot.slane %v1481_v35, 1  ;;  %v1446_v11 = vrot.slane %v1445_v37, 1  ;;  %v1474_v15 = vadd.f32 %v1473_v40, %v1472_v34  ;;  %v1592_v4 = vrot.slane %v1588_v42, 3 }
 0x2cf   :  { %v1437_v14 = vmul.f32 %v1404_v26, %v1350_v41  ;;  %v1503_v62 = vsel %vm72_vm1, %v1438_v47, 0.0  ;;  %v1496_v24 = vrot.slane %v1495_v28, 4  ;;  %v1490_v36 = vadd.f32 %v1489_v63, %v1488_v56 }
 0x2d0   :  { %v1455_v54 = vrot.slane %v1454_v12, 1  ;;  %v1590_v47 = vrot.slane %v1588_v42, 1  ;;  %v1591_v26 = vrot.slane %v1588_v42, 2  ;;  %v1483_v16 = vadd.f32 %v1482_v8, %v1481_v35 }
 0x2d1   :  { %v1502_v9 = vsel %vm72_vm1, %v1437_v14, 0.0  ;;  %v1497_v27 = vadd.f32 %v1496_v24, %v1495_v28  ;;  %v1491_v44 = vrot.slane %v1490_v36, 1  ;;  %v1447_v43 = vadd.f32 %v1446_v11, %v1445_v37 }
 0x2d2   :  { %v1504_v45 = vadd.f32 %v1503_v62, %v1502_v9  ;;  %v1456_v13 = vadd.f32 %v1455_v54, %v1454_v12  ;;  %v1465_v23 = vadd.f32 %v1464_v21, %v1463_v38  ;;  %v1596_v14 = vrot.slane %v1588_v42, 7 }
 0x2d3   :  { %v1498_v29 = vrot.slane %v1497_v27, 2  ;;  %v1492_v17 = vadd.f32 %v1491_v44, %v1490_v36  ;;  %v1593_v22 = vrot.slane %v1588_v42, 4  ;;  %v1594_v19 = vrot.slane %v1588_v42, 5 }
 0x2d4   :  { %v1505_v51 = vrot.slane %v1504_v45, 4  ;;  %v1595_v20 = vrot.slane %v1588_v42, 6  ;;  %v1605_v25 = vadd.f32 %v1588_v42, %v1447_v43  ;;  %v1606_v28 = vadd.f32 %v1590_v47, %v1456_v13 }
 0x2d5   :  { %v1499_v3 = vadd.f32 %v1498_v29, %v1497_v27  ;;  %v1607_v58 = vadd.f32 %v1591_v26, %v1465_v23  ;;  %v1608_v0 = vadd.f32 %v1592_v4, %v1474_v15  ;;  %v1609_v9 = vadd.f32 %v1593_v22, %v1483_v16 }
 0x2d6   :  { %v1506_v57 = vadd.f32 %v1505_v51, %v1504_v45  ;;  %v1610_v45 = vadd.f32 %v1594_v19, %v1492_v17 }
 0x2d7   :  { %v1500_v2 = vrot.slane %v1499_v3, 1 }
 0x2d8   :  { %v1507_v30 = vrot.slane %v1506_v57, 2 }
 0x2d9   :  { %v1501_v18 = vadd.f32 %v1500_v2, %v1499_v3 }
 0x2da   :  { %v1508_v48 = vadd.f32 %v1507_v30, %v1506_v57 }
 0x2db   :  { %v1611_v49 = vadd.f32 %v1595_v20, %v1501_v18 }
 0x2dc   :  { %v1509_v10 = vrot.slane %v1508_v48, 1 }
 0x2de   :  { %v1510_v41 = vadd.f32 %v1509_v10, %v1508_v48 }
 0x2e0   :  { %v1612_v62 = vadd.f32 %v1596_v14, %v1510_v41  ;;  %v1885_v41 = vld [vmem:[%s2770_s8] ss:$0 sm:$0xff] }
 0x2ec   :  { %v1682_v46 = vpop.f32.mrf.mxu1 }
 0x2ed   :  { %v1687_v50 = vrot.slane %v1682_v46, 1  ;;  %v1688_v24 = vrot.slane %v1682_v46, 2  ;;  %v1689_v51 = vrot.slane %v1682_v46, 3  ;;  %v1690_v7 = vrot.slane %v1682_v46, 4 }
 0x2ee   :  { %v1691_v6 = vrot.slane %v1682_v46, 5  ;;  %v1692_v53 = vrot.slane %v1682_v46, 6  ;;  %v1693_v1 = vrot.slane %v1682_v46, 7  ;;  %v1702_v55 = vmul.f32 %v1682_v46, %v1605_v25  ;;  %v2107_v56 = vpop.f32.mrf.mxu1 }
 0x2ef   :  { %v1703_v27 = vmul.f32 %v1687_v50, %v1606_v28  ;;  %v1704_v57 = vmul.f32 %v1688_v24, %v1607_v58  ;;  %v1705_v59 = vmul.f32 %v1689_v51, %v1608_v0  ;;  %v1706_v60 = vmul.f32 %v1690_v7, %v1609_v9 }
 0x2f0   :  { %v1707_v5 = vmul.f32 %v1691_v6, %v1610_v45  ;;  %v1710_v61 = vpack.c.bf16 %v1702_v55, %v1702_v55  ;;  %v1708_v52 = vmul.f32 %v1692_v53, %v1611_v49  ;;  %v1709_v63 = vmul.f32 %v1693_v1, %v1612_v62 }
 0x2f1   :  { %v1711_v29 = vpack.c.bf16 %v1703_v27, %v1703_v27  ;;  %v1712_v30 = vpack.c.bf16 %v1704_v57, %v1704_v57  ;;  %v1713_v31 = vpack.c.bf16 %v1705_v59, %v1705_v59  ;;  %v1714_v32 = vpack.c.bf16 %v1706_v60, %v1706_v60 }
 0x2f2   :  { %v1715_v33 = vpack.c.bf16 %v1707_v5, %v1707_v5  ;;  %v1716_v34 = vpack.c.bf16 %v1708_v52, %v1708_v52  ;;  %v1717_v48 = vpack.c.bf16 %v1709_v63, %v1709_v63  ;;  %v1737_v12 = vunpack.c.l.b16 %v1710_v61 }
 0x2f3   :  { %v1738_v35 = vunpack.c.l.b16 %v1711_v29  ;;  %v1739_v36 = vunpack.c.l.b16 %v1712_v30  ;;  %v1740_v3 = vunpack.c.l.b16 %v1713_v31  ;;  %v1741_v37 = vunpack.c.l.b16 %v1714_v32 }
 0x2f4   :  { %v1742_v40 = vunpack.c.l.b16 %v1715_v33  ;;  %v1743_v42 = vunpack.c.l.b16 %v1716_v34  ;;  %v1744_v2 = vunpack.c.l.b16 %v1717_v48 }
 0x2f5   :  { %v1745_v38 = vrot.slane %v1738_v35, 7  ;;  %v1747_v39 = vrot.slane %v1739_v36, 6  ;;  %v1749_v44 = vrot.slane %v1740_v3, 5  ;;  %v1751_v10 = vrot.slane %v1741_v37, 4 }
 0x2f6   :  { %v1753_v21 = vrot.slane %v1742_v40, 3  ;;  %v1755_v47 = vrot.slane %v1743_v42, 2  ;;  %v1757_v4 = vrot.slane %v1744_v2, 1 }
 0x2f7   :  { %v1746_v8 = vsel %vm230_vm2, %v1745_v38, %v1737_v12 }
 0x2f8   :  { %v1748_v11 = vsel %vm233_vm3, %v1747_v39, %v1746_v8 }
 0x2f9   :  { %v1750_v54 = vsel %vm236_vm4, %v1749_v44, %v1748_v11 }
 0x2fa   :  { %v1752_v15 = vsel %vm239_vm5, %v1751_v10, %v1750_v54 }
 0x2fb   :  { %v1754_v26 = vsel %vm242_vm6, %v1753_v21, %v1752_v15 }
 0x2fc   :  { %v1756_v16 = vsel %vm245_vm7, %v1755_v47, %v1754_v26 }
 0x2fd   :  { %v1758_v17 = vsel %vm248_vm8, %v1757_v4, %v1756_v16 }
 0x2fe   :  { %v1759_v18 = vpack.c.b16 %v1758_v17, %v1758_v17 }
 0x300   :  { %2113 = vmatmul.mubr.msk.bf16.vlgmr.msra.gmra.mxu1 %vm72_vm1, %v1759_v18 }
 0x3c0   :  { %v1809_v43 = vpop.f32.mrf.mxu1 }
 0x3c1   :  { %v1810_v13 = vadd.f32 %v1885_v41, %v1809_v43 }
 0x3c2   :  { %v2114_v23 = vpop.f32.mrf.mxu1 }
 0x3c3   :  { %1815 = vst [vmem:[#allocation2] sm:$0xff] %v1810_v13 }
 0x3c4   :  { %v1812_v14 = vpop.f32.mrf.mxu1 }
 0x3c5   :  { %2174 = shalt.err (!%p2171_p4)
}
 0x3c6   :  { %1825 = dma.vmem_to_hbm [thread:$0]  %s1823_s19, 128, %s2773_s11, [#allocation3]   ;;  %v2115_v22 = vpop.f32.mrf.mxu1 }
 0x3c7   :  { %2183 = dma.done.wait [#allocation3], 128  }
 0x3c8   :  { %2184 = vsyncadd [#allocation3], 4294967168 }
 0x3c9   :  { %1829 = vsyncpa [#allocation3], 1 }

</bundles_post_ra>
